<compile_context>
chip_gen: v7x
topology: tpu7x:2x2x1
jax: 0.10.0
libtpu: 0.0.40
codegen_flags: <defaults>
</compile_context>

<pallas_src>
import functools

import jax
import jax.numpy as jnp
import numpy as np
from jax import lax
from jax.experimental import pallas as pl
from jax.experimental.pallas import tpu as pltpu


def _cdiv(a, b):
    return (a + b - 1) // b


def _primary_caps_kernel(x_ref, w_ref, b_ref, g_ref, o_ref, acc_ref, *,
                         kernel_size, stride, h_out, w_out, eps=1e-12):
    """One grid step: direct conv + bias + capsule squash for a tile of images.

    x_ref  : (nb, stride*stride, Hs, Ws, C_in)  phase-split padded input (bf16)
    w_ref  : (k, k, C_in, C_out)                conv weight (bf16), resident
    b_ref  : (1, C_out)                         bias (f32), resident
    g_ref  : (C_out, C_out)                     block-diag capsule group-sum (f32)
    o_ref  : (nb*h_out*w_out, C_out)            squashed capsule outputs (f32)
    acc_ref: VMEM scratch (nb*h_out*w_out, C_out) f32 accumulator
    """
    k = kernel_size
    nb = x_ref.shape[0]
    c_in = x_ref.shape[-1]
    m_blk = nb * h_out * w_out

    acc_ref[...] = jnp.zeros_like(acc_ref)

    # Direct convolution (no im2col in HBM): for each kernel row i, load one
    # slab with full trailing dims (clean, tile-aligned load) covering all
    # column phases, cast the bf16 stream to f32, then accumulate the k column
    # offsets as (rows, C_in) @ (C_in, C_out) matmuls.
    for i in range(k):
        ph, oi = i % stride, i // stride
        slab = x_ref[:, ph * stride:(ph + 1) * stride, oi:oi + h_out, :, :]
        slab = slab.astype(jnp.float32)           # bf16 stream -> f32 compute
        for j in range(k):
            pw, oj = j % stride, j // stride
            xs = slab[:, pw, :, oj:oj + w_out, :].reshape(m_blk, c_in)
            acc_ref[...] += jnp.dot(
                xs, w_ref[i, j].astype(jnp.float32),
                preferred_element_type=jnp.float32)

    acc = acc_ref[...] + b_ref[...]

    # Capsule squash, kept in (rows, C_out) lane layout:
    #  * per-capsule |v|^2 via a block-diagonal ones matmul (MXU is nearly idle
    #    here) instead of a reshape-to-(caps, dim) + cross-lane reduce,
    #  * scale = sqrt(l2) / (1 + l2) via EUP rsqrt + approx reciprocal
    #    (eps keeps zero-norm capsules at exactly 0 instead of NaN).
    sq = acc * acc
    l2 = jnp.dot(sq, g_ref[...], preferred_element_type=jnp.float32)
    scale = (l2 * lax.rsqrt(l2 + eps)) * pl.reciprocal(1.0 + l2, approx=True)
    o_ref[...] = (acc * scale).astype(o_ref.dtype)


def _choose_batch_tile(n, rows_per_image, in_bytes_per_image, *,
                       target_rows=1024, max_in_block_bytes=4 * 1024 * 1024):
    """Images per grid step: big enough to amortize per-step overhead, small
    enough for VMEM (v7x: 64 MiB/TC), and keep >=2 parallel grid steps."""
    nb = max(1, target_rows // max(1, rows_per_image))
    nb = min(nb, max(1, max_in_block_bytes // max(1, in_bytes_per_image)))
    nb = min(nb, n)
    min_steps = 4 if n >= 4 else (2 if n >= 2 else 1)   # feed both v7x TCs
    nb = min(nb, max(1, n // min_steps))
    return max(1, nb)


def primary_caps_forward(x_nchw, weight, bias, *, output_caps, output_dim,
                         kernel_size, stride, padding, batch_tile=None,
                         compute_dtype=jnp.bfloat16):
    """Forward pass matching PyTorch PrimaryCapsLayer.

    x_nchw: (N, C_in, H, W) float32
    weight: (C_out, C_in, kh, kw) PyTorch Conv2d layout, C_out = caps*dim
    bias:   (C_out,)
    returns (N, output_caps * H_out * W_out, output_dim) float32
    """
    N, C_in, H, W = x_nchw.shape
    k = kernel_size
    C_out = output_caps * output_dim

    Hp, Wp = H + 2 * padding, W + 2 * padding
    Ho = (Hp - k) // stride + 1
    Wo = (Wp - k) // stride + 1
    assert Ho > 0 and Wo > 0

    # Phase-split ("space-to-batch") layout so every kernel-offset access inside
    # the Pallas kernel is a contiguous slice: pad H/W to multiples of stride
    # and rearrange to (N, stride*stride, Hs, Ws, C_in).  No data duplication.
    Hp2 = _cdiv(Hp, stride) * stride
    Wp2 = _cdiv(Wp, stride) * stride
    Hs, Ws = Hp2 // stride, Wp2 // stride

    itemsize = jnp.dtype(compute_dtype).itemsize
    rows_per_image = Ho * Wo
    in_bytes_per_image = stride * stride * Hs * Ws * C_in * itemsize
    nb = batch_tile if batch_tile is not None else _choose_batch_tile(
        N, rows_per_image, in_bytes_per_image)
    N_pad = _cdiv(N, nb) * nb
    M_blk = nb * rows_per_image

    x = jnp.transpose(x_nchw, (0, 2, 3, 1)).astype(jnp.float32)        # NHWC
    x = jnp.pad(x, ((0, N_pad - N),
                    (padding, padding + (Hp2 - Hp)),
                    (padding, padding + (Wp2 - Wp)),
                    (0, 0)))
    xph = x.reshape(N_pad, Hs, stride, Ws, stride, C_in)
    xph = jnp.transpose(xph, (0, 2, 4, 1, 3, 5))
    xph = xph.reshape(N_pad, stride * stride, Hs, Ws, C_in).astype(compute_dtype)

    # PyTorch (C_out, C_in, kh, kw) -> (kh, kw, C_in, C_out); streamed in bf16.
    wt = jnp.transpose(weight, (2, 3, 1, 0)).astype(compute_dtype)
    b2 = bias.reshape(1, C_out).astype(jnp.float32)

    # Block-diagonal capsule "group sum" matrix used by the squash reduction.
    caps_id = np.arange(C_out) // output_dim
    g = jnp.asarray((caps_id[:, None] == caps_id[None, :]).astype(np.float32))

    kernel = functools.partial(_primary_caps_kernel, kernel_size=k,
                               stride=stride, h_out=Ho, w_out=Wo)

    grid = (N_pad // nb,)
    out_shape = jax.ShapeDtypeStruct((N_pad * rows_per_image, C_out), jnp.float32)

    # Explicit VMEM budget: double-buffered streamed blocks + resident weights
    # + scratch, with headroom; kept below v7x's 64 MiB per TensorCore.
    in_blk_bytes = nb * stride * stride * Hs * Ws * C_in * itemsize
    out_blk_bytes = M_blk * C_out * 4
    resident_bytes = int(wt.size) * itemsize + int(b2.size) * 4 + int(g.size) * 4
    needed = 2 * in_blk_bytes + 2 * out_blk_bytes + resident_bytes + M_blk * C_out * 4
    vmem_limit_bytes = int(min(64 * 1024 * 1024,
                               max(32 * 1024 * 1024, 2 * needed)))

    flops = (2 * N_pad * rows_per_image * (k * k * C_in) * C_out
             + 2 * N_pad * rows_per_image * C_out * C_out)
    transcendentals = 2 * N_pad * rows_per_image * C_out
    bytes_accessed = (int(xph.size) * itemsize + resident_bytes
                      + N_pad * rows_per_image * C_out * 4)

    # NOTE on the "lane-dense output" suggestion: C_out (= caps*dim) is < 128
    # lanes, but after the direct-conv restructure the epilogue store is only a
    # few vregs per grid step (the k^2 matmuls dominate), and repacking to a
    # 128-lane slab would need a lane-crossing relayout of comparable cost, so
    # the output keeps the natural (rows, C_out) layout.
    out = pl.pallas_call(
        kernel,
        out_shape=out_shape,
        grid_spec=pltpu.PrefetchScalarGridSpec(
            num_scalar_prefetch=0,
            grid=grid,
            in_specs=[
                pl.BlockSpec((nb, stride * stride, Hs, Ws, C_in),
                             lambda nblk: (nblk, 0, 0, 0, 0)),
                pl.BlockSpec((k, k, C_in, C_out), lambda nblk: (0, 0, 0, 0)),
                pl.BlockSpec((1, C_out), lambda nblk: (0, 0)),
                pl.BlockSpec((C_out, C_out), lambda nblk: (0, 0)),
            ],
            out_specs=pl.BlockSpec((M_blk, C_out), lambda nblk: (nblk, 0)),
            scratch_shapes=[pltpu.VMEM((M_blk, C_out), jnp.float32)],
        ),
        compiler_params=pltpu.CompilerParams(
            dimension_semantics=("parallel",),
            vmem_limit_bytes=vmem_limit_bytes),
        cost_estimate=pl.CostEstimate(flops=flops,
                                      transcendentals=transcendentals,
                                      bytes_accessed=bytes_accessed),
    )(xph, wt, b2, g)

    # layout glue: (N_pad*Ho*Wo, caps*dim) -> (N, caps*Ho*Wo, dim)
    out = out.reshape(N_pad, Ho, Wo, output_caps, output_dim)[:N]
    out = jnp.transpose(out, (0, 3, 1, 2, 4))
    return out.reshape(N, output_caps * Ho * Wo, output_dim)


def primary_caps_reference(x_nchw, weight, bias, *, output_caps, output_dim,
                           stride, padding):
    """Pure-JAX reference mirroring the PyTorch module (for verification)."""
    out = lax.conv_general_dilated(
        x_nchw.astype(jnp.float32), weight.astype(jnp.float32),
        window_strides=(stride, stride),
        padding=[(padding, padding), (padding, padding)],
        dimension_numbers=("NCHW", "OIHW", "NCHW"),
    ) + bias.reshape(1, -1, 1, 1)
    N, C, H, W = out.shape
    out = out.reshape(N, output_caps, output_dim, H, W)
    out = jnp.transpose(out, (0, 1, 3, 4, 2)).reshape(N, -1, output_dim)
    lengths2 = jnp.sum(out ** 2, axis=2)
    lengths = jnp.sqrt(lengths2)
    scale = (lengths2 / (1.0 + lengths2) / lengths)[..., None]
    return out * scale


if __name__ == "__main__":
    # Small PrimaryCapsLayer config
    input_channels, output_caps, output_dim = 4, 4, 8
    kernel_size, stride, padding = 3, 2, 1
    N, H, W = 2, 16, 16
    C_out = output_caps * output_dim

    key = jax.random.PRNGKey(0)
    kx, kw, kb = jax.random.split(key, 3)
    x = jax.random.normal(kx, (N, input_channels, H, W), dtype=jnp.float32)
    # deterministic conv parameter init (synthetic, not a checkpoint)
    fan_in = input_channels * kernel_size * kernel_size
    bound = 1.0 / np.sqrt(fan_in)
    weight = jax.random.uniform(kw, (C_out, input_channels, kernel_size, kernel_size),
                                minval=-bound, maxval=bound, dtype=jnp.float32)
    bias = jax.random.uniform(kb, (C_out,), minval=-bound, maxval=bound,
                              dtype=jnp.float32)

    fwd = jax.jit(functools.partial(
        primary_caps_forward,
        output_caps=output_caps, output_dim=output_dim,
        kernel_size=kernel_size, stride=stride, padding=padding))
    out = jax.block_until_ready(fwd(x, weight, bias))

    Ho = (H + 2 * padding - kernel_size) // stride + 1
    Wo = (W + 2 * padding - kernel_size) // stride + 1
    assert out.shape == (N, output_caps * Ho * Wo, output_dim), out.shape

    ref_kwargs = dict(output_caps=output_caps, output_dim=output_dim,
                      stride=stride, padding=padding)

    # Tight check: reference fed the same bf16-rounded activations/weights
    # (isolates kernel math; tolerance also covers the EUP approx reciprocal).
    x_q = x.astype(jnp.bfloat16).astype(jnp.float32)
    w_q = weight.astype(jnp.bfloat16).astype(jnp.float32)
    ref_q = jax.block_until_ready(
        primary_caps_reference(x_q, w_q, bias, **ref_kwargs))
    np.testing.assert_allclose(np.asarray(out), np.asarray(ref_q),
                               atol=1e-2, rtol=1e-2)

    # Looser check against full-f32 module semantics (kernel streams in bf16).
    ref = jax.block_until_ready(
        primary_caps_reference(x, weight, bias, **ref_kwargs))
    np.testing.assert_allclose(np.asarray(out), np.asarray(ref),
                               atol=5e-2, rtol=5e-2)
    print("KERNEL_OK")
</pallas_src>

<mosaic_0001>
module attributes {stable_mosaic.version = 11 : i64} {
  func.func @_primary_caps_kernel(%arg0: i32, %arg1: memref<1x4x9x9x4xbf16, #tpu.memory_space<vmem>>, %arg2: memref<3x3x4x32xbf16, #tpu.memory_space<vmem>>, %arg3: memref<1x32xf32, #tpu.memory_space<vmem>>, %arg4: memref<32x32xf32, #tpu.memory_space<vmem>>, %arg5: memref<64x32xf32, #tpu.memory_space<vmem>>, %arg6: memref<64x32xf32, #tpu.memory_space<vmem>>) attributes {dimension_semantics = [#tpu.dimension_semantics<parallel>], iteration_bounds = array<i64: 2>, scalar_prefetch = 0 : i64, scratch_operands = 1 : i64, tpu.core_type = #tpu.core_type<tc>, window_params = [{transform_indices = @transform_0, window_bounds = array<i64: 1, 4, 9, 9, 4>}, {pipeline_mode = #tpu.pipeline_mode<synchronous>, transform_indices = @transform_1, window_bounds = array<i64: 3, 3, 4, 32>}, {pipeline_mode = #tpu.pipeline_mode<synchronous>, transform_indices = @transform_2, window_bounds = array<i64: 1, 32>}, {pipeline_mode = #tpu.pipeline_mode<synchronous>, transform_indices = @transform_3, window_bounds = array<i64: 32, 32>}, {transform_indices = @transform_4, window_bounds = array<i64: 64, 32>}]} {
    %cst = arith.constant 0.000000e+00 : f32
    %0 = vector.broadcast %cst : f32 to vector<64x32xf32>
    %c0 = arith.constant 0 : index
    %c0_0 = arith.constant 0 : index
    %1 = vector.load %arg6[%c0, %c0_0] : memref<64x32xf32, #tpu.memory_space<vmem>>, vector<64x32xf32>
    tpu.vector_store %arg6[%c0, %c0_0], %0 {strides = array<i32>} : memref<64x32xf32, #tpu.memory_space<vmem>>, vector<64x32xf32>,
    %c0_1 = arith.constant 0 : index
    %c0_2 = arith.constant 0 : index
    %c0_3 = arith.constant 0 : index
    %c0_4 = arith.constant 0 : index
    %c0_5 = arith.constant 0 : index
    %2 = vector.load %arg1[%c0_1, %c0_2, %c0_3, %c0_4, %c0_5] : memref<1x4x9x9x4xbf16, #tpu.memory_space<vmem>>, vector<1x2x8x9x4xbf16>
    %3 = arith.extf %2 : vector<1x2x8x9x4xbf16> to vector<1x2x8x9x4xf32>
    %4 = vector.extract_strided_slice %3 {offsets = [0, 0, 0, 0, 0], sizes = [1, 1, 8, 8, 4], strides = [1, 1, 1, 1, 1]} : vector<1x2x8x9x4xf32> to vector<1x1x8x8x4xf32>
    %5 = vector.shape_cast %4 : vector<1x1x8x8x4xf32> to vector<1x8x8x4xf32>
    %6 = vector.shape_cast %5 : vector<1x8x8x4xf32> to vector<64x4xf32>
    %c0_6 = arith.constant 0 : index
    %c0_7 = arith.constant 0 : index
    %7 = vector.load %arg6[%c0_6, %c0_7] : memref<64x32xf32, #tpu.memory_space<vmem>>, vector<64x32xf32>
    %c0_8 = arith.constant 0 : index
    %c0_9 = arith.constant 0 : index
    %c0_10 = arith.constant 0 : index
    %c0_11 = arith.constant 0 : index
    %8 = vector.load %arg2[%c0_8, %c0_9, %c0_10, %c0_11] : memref<3x3x4x32xbf16, #tpu.memory_space<vmem>>, vector<1x1x4x32xbf16>
    %9 = vector.shape_cast %8 : vector<1x1x4x32xbf16> to vector<4x32xbf16>
    %10 = arith.extf %9 : vector<4x32xbf16> to vector<4x32xf32>
    %cst_12 = arith.constant dense<0.000000e+00> : vector<64x32xf32>
    %11 = tpu.matmul %6, %10, %cst_12 {dimension_numbers = #tpu.dot_dimension_numbers<[1], [0], [0], [1], [0, 0, 1, 1], [], []>} : vector<64x4xf32>, vector<4x32xf32>, vector<64x32xf32> -> vector<64x32xf32>
    %12 = arith.addf %7, %11 : vector<64x32xf32>
    %c0_13 = arith.constant 0 : index
    %c0_14 = arith.constant 0 : index
    %13 = vector.load %arg6[%c0_13, %c0_14] : memref<64x32xf32, #tpu.memory_space<vmem>>, vector<64x32xf32>
    tpu.vector_store %arg6[%c0_13, %c0_14], %12 {strides = array<i32>} : memref<64x32xf32, #tpu.memory_space<vmem>>, vector<64x32xf32>,
    %14 = vector.extract_strided_slice %3 {offsets = [0, 1, 0, 0, 0], sizes = [1, 1, 8, 8, 4], strides = [1, 1, 1, 1, 1]} : vector<1x2x8x9x4xf32> to vector<1x1x8x8x4xf32>
    %15 = vector.shape_cast %14 : vector<1x1x8x8x4xf32> to vector<1x8x8x4xf32>
    %16 = vector.shape_cast %15 : vector<1x8x8x4xf32> to vector<64x4xf32>
    %c0_15 = arith.constant 0 : index
    %c0_16 = arith.constant 0 : index
    %17 = vector.load %arg6[%c0_15, %c0_16] : memref<64x32xf32, #tpu.memory_space<vmem>>, vector<64x32xf32>
    %c0_17 = arith.constant 0 : index
    %c1 = arith.constant 1 : index
    %c0_18 = arith.constant 0 : index
    %c0_19 = arith.constant 0 : index
    %18 = vector.load %arg2[%c0_17, %c1, %c0_18, %c0_19] : memref<3x3x4x32xbf16, #tpu.memory_space<vmem>>, vector<1x1x4x32xbf16>
    %19 = vector.shape_cast %18 : vector<1x1x4x32xbf16> to vector<4x32xbf16>
    %20 = arith.extf %19 : vector<4x32xbf16> to vector<4x32xf32>
    %cst_20 = arith.constant dense<0.000000e+00> : vector<64x32xf32>
    %21 = tpu.matmul %16, %20, %cst_20 {dimension_numbers = #tpu.dot_dimension_numbers<[1], [0], [0], [1], [0, 0, 1, 1], [], []>} : vector<64x4xf32>, vector<4x32xf32>, vector<64x32xf32> -> vector<64x32xf32>
    %22 = arith.addf %17, %21 : vector<64x32xf32>
    %c0_21 = arith.constant 0 : index
    %c0_22 = arith.constant 0 : index
    %23 = vector.load %arg6[%c0_21, %c0_22] : memref<64x32xf32, #tpu.memory_space<vmem>>, vector<64x32xf32>
    tpu.vector_store %arg6[%c0_21, %c0_22], %22 {strides = array<i32>} : memref<64x32xf32, #tpu.memory_space<vmem>>, vector<64x32xf32>,
    %24 = vector.extract_strided_slice %3 {offsets = [0, 0, 0, 1, 0], sizes = [1, 1, 8, 8, 4], strides = [1, 1, 1, 1, 1]} : vector<1x2x8x9x4xf32> to vector<1x1x8x8x4xf32>
    %25 = vector.shape_cast %24 : vector<1x1x8x8x4xf32> to vector<1x8x8x4xf32>
    %26 = vector.shape_cast %25 : vector<1x8x8x4xf32> to vector<64x4xf32>
    %c0_23 = arith.constant 0 : index
    %c0_24 = arith.constant 0 : index
    %27 = vector.load %arg6[%c0_23, %c0_24] : memref<64x32xf32, #tpu.memory_space<vmem>>, vector<64x32xf32>
    %c0_25 = arith.constant 0 : index
    %c2 = arith.constant 2 : index
    %c0_26 = arith.constant 0 : index
    %c0_27 = arith.constant 0 : index
    %28 = vector.load %arg2[%c0_25, %c2, %c0_26, %c0_27] : memref<3x3x4x32xbf16, #tpu.memory_space<vmem>>, vector<1x1x4x32xbf16>
    %29 = vector.shape_cast %28 : vector<1x1x4x32xbf16> to vector<4x32xbf16>
    %30 = arith.extf %29 : vector<4x32xbf16> to vector<4x32xf32>
    %cst_28 = arith.constant dense<0.000000e+00> : vector<64x32xf32>
    %31 = tpu.matmul %26, %30, %cst_28 {dimension_numbers = #tpu.dot_dimension_numbers<[1], [0], [0], [1], [0, 0, 1, 1], [], []>} : vector<64x4xf32>, vector<4x32xf32>, vector<64x32xf32> -> vector<64x32xf32>
    %32 = arith.addf %27, %31 : vector<64x32xf32>
    %c0_29 = arith.constant 0 : index
    %c0_30 = arith.constant 0 : index
    %33 = vector.load %arg6[%c0_29, %c0_30] : memref<64x32xf32, #tpu.memory_space<vmem>>, vector<64x32xf32>
    tpu.vector_store %arg6[%c0_29, %c0_30], %32 {strides = array<i32>} : memref<64x32xf32, #tpu.memory_space<vmem>>, vector<64x32xf32>,
    %c0_31 = arith.constant 0 : index
    %c2_32 = arith.constant 2 : index
    %c0_33 = arith.constant 0 : index
    %c0_34 = arith.constant 0 : index
    %c0_35 = arith.constant 0 : index
    %34 = vector.load %arg1[%c0_31, %c2_32, %c0_33, %c0_34, %c0_35] : memref<1x4x9x9x4xbf16, #tpu.memory_space<vmem>>, vector<1x2x8x9x4xbf16>
    %35 = arith.extf %34 : vector<1x2x8x9x4xbf16> to vector<1x2x8x9x4xf32>
    %36 = vector.extract_strided_slice %35 {offsets = [0, 0, 0, 0, 0], sizes = [1, 1, 8, 8, 4], strides = [1, 1, 1, 1, 1]} : vector<1x2x8x9x4xf32> to vector<1x1x8x8x4xf32>
    %37 = vector.shape_cast %36 : vector<1x1x8x8x4xf32> to vector<1x8x8x4xf32>
    %38 = vector.shape_cast %37 : vector<1x8x8x4xf32> to vector<64x4xf32>
    %c0_36 = arith.constant 0 : index
    %c0_37 = arith.constant 0 : index
    %39 = vector.load %arg6[%c0_36, %c0_37] : memref<64x32xf32, #tpu.memory_space<vmem>>, vector<64x32xf32>
    %c1_38 = arith.constant 1 : index
    %c0_39 = arith.constant 0 : index
    %c0_40 = arith.constant 0 : index
    %c0_41 = arith.constant 0 : index
    %40 = vector.load %arg2[%c1_38, %c0_39, %c0_40, %c0_41] : memref<3x3x4x32xbf16, #tpu.memory_space<vmem>>, vector<1x1x4x32xbf16>
    %41 = vector.shape_cast %40 : vector<1x1x4x32xbf16> to vector<4x32xbf16>
    %42 = arith.extf %41 : vector<4x32xbf16> to vector<4x32xf32>
    %cst_42 = arith.constant dense<0.000000e+00> : vector<64x32xf32>
    %43 = tpu.matmul %38, %42, %cst_42 {dimension_numbers = #tpu.dot_dimension_numbers<[1], [0], [0], [1], [0, 0, 1, 1], [], []>} : vector<64x4xf32>, vector<4x32xf32>, vector<64x32xf32> -> vector<64x32xf32>
    %44 = arith.addf %39, %43 : vector<64x32xf32>
    %c0_43 = arith.constant 0 : index
    %c0_44 = arith.constant 0 : index
    %45 = vector.load %arg6[%c0_43, %c0_44] : memref<64x32xf32, #tpu.memory_space<vmem>>, vector<64x32xf32>
    tpu.vector_store %arg6[%c0_43, %c0_44], %44 {strides = array<i32>} : memref<64x32xf32, #tpu.memory_space<vmem>>, vector<64x32xf32>,
    %46 = vector.extract_strided_slice %35 {offsets = [0, 1, 0, 0, 0], sizes = [1, 1, 8, 8, 4], strides = [1, 1, 1, 1, 1]} : vector<1x2x8x9x4xf32> to vector<1x1x8x8x4xf32>
    %47 = vector.shape_cast %46 : vector<1x1x8x8x4xf32> to vector<1x8x8x4xf32>
    %48 = vector.shape_cast %47 : vector<1x8x8x4xf32> to vector<64x4xf32>
    %c0_45 = arith.constant 0 : index
    %c0_46 = arith.constant 0 : index
    %49 = vector.load %arg6[%c0_45, %c0_46] : memref<64x32xf32, #tpu.memory_space<vmem>>, vector<64x32xf32>
    %c1_47 = arith.constant 1 : index
    %c1_48 = arith.constant 1 : index
    %c0_49 = arith.constant 0 : index
    %c0_50 = arith.constant 0 : index
    %50 = vector.load %arg2[%c1_47, %c1_48, %c0_49, %c0_50] : memref<3x3x4x32xbf16, #tpu.memory_space<vmem>>, vector<1x1x4x32xbf16>
    %51 = vector.shape_cast %50 : vector<1x1x4x32xbf16> to vector<4x32xbf16>
    %52 = arith.extf %51 : vector<4x32xbf16> to vector<4x32xf32>
    %cst_51 = arith.constant dense<0.000000e+00> : vector<64x32xf32>
    %53 = tpu.matmul %48, %52, %cst_51 {dimension_numbers = #tpu.dot_dimension_numbers<[1], [0], [0], [1], [0, 0, 1, 1], [], []>} : vector<64x4xf32>, vector<4x32xf32>, vector<64x32xf32> -> vector<64x32xf32>
    %54 = arith.addf %49, %53 : vector<64x32xf32>
    %c0_52 = arith.constant 0 : index
    %c0_53 = arith.constant 0 : index
    %55 = vector.load %arg6[%c0_52, %c0_53] : memref<64x32xf32, #tpu.memory_space<vmem>>, vector<64x32xf32>
    tpu.vector_store %arg6[%c0_52, %c0_53], %54 {strides = array<i32>} : memref<64x32xf32, #tpu.memory_space<vmem>>, vector<64x32xf32>,
    %56 = vector.extract_strided_slice %35 {offsets = [0, 0, 0, 1, 0], sizes = [1, 1, 8, 8, 4], strides = [1, 1, 1, 1, 1]} : vector<1x2x8x9x4xf32> to vector<1x1x8x8x4xf32>
    %57 = vector.shape_cast %56 : vector<1x1x8x8x4xf32> to vector<1x8x8x4xf32>
    %58 = vector.shape_cast %57 : vector<1x8x8x4xf32> to vector<64x4xf32>
    %c0_54 = arith.constant 0 : index
    %c0_55 = arith.constant 0 : index
    %59 = vector.load %arg6[%c0_54, %c0_55] : memref<64x32xf32, #tpu.memory_space<vmem>>, vector<64x32xf32>
    %c1_56 = arith.constant 1 : index
    %c2_57 = arith.constant 2 : index
    %c0_58 = arith.constant 0 : index
    %c0_59 = arith.constant 0 : index
    %60 = vector.load %arg2[%c1_56, %c2_57, %c0_58, %c0_59] : memref<3x3x4x32xbf16, #tpu.memory_space<vmem>>, vector<1x1x4x32xbf16>
    %61 = vector.shape_cast %60 : vector<1x1x4x32xbf16> to vector<4x32xbf16>
    %62 = arith.extf %61 : vector<4x32xbf16> to vector<4x32xf32>
    %cst_60 = arith.constant dense<0.000000e+00> : vector<64x32xf32>
    %63 = tpu.matmul %58, %62, %cst_60 {dimension_numbers = #tpu.dot_dimension_numbers<[1], [0], [0], [1], [0, 0, 1, 1], [], []>} : vector<64x4xf32>, vector<4x32xf32>, vector<64x32xf32> -> vector<64x32xf32>
    %64 = arith.addf %59, %63 : vector<64x32xf32>
    %c0_61 = arith.constant 0 : index
    %c0_62 = arith.constant 0 : index
    %65 = vector.load %arg6[%c0_61, %c0_62] : memref<64x32xf32, #tpu.memory_space<vmem>>, vector<64x32xf32>
    tpu.vector_store %arg6[%c0_61, %c0_62], %64 {strides = array<i32>} : memref<64x32xf32, #tpu.memory_space<vmem>>, vector<64x32xf32>,
    %c0_63 = arith.constant 0 : index
    %c0_64 = arith.constant 0 : index
    %c1_65 = arith.constant 1 : index
    %c0_66 = arith.constant 0 : index
    %c0_67 = arith.constant 0 : index
    %66 = vector.load %arg1[%c0_63, %c0_64, %c1_65, %c0_66, %c0_67] : memref<1x4x9x9x4xbf16, #tpu.memory_space<vmem>>, vector<1x2x8x9x4xbf16>
    %67 = arith.extf %66 : vector<1x2x8x9x4xbf16> to vector<1x2x8x9x4xf32>
    %68 = vector.extract_strided_slice %67 {offsets = [0, 0, 0, 0, 0], sizes = [1, 1, 8, 8, 4], strides = [1, 1, 1, 1, 1]} : vector<1x2x8x9x4xf32> to vector<1x1x8x8x4xf32>
    %69 = vector.shape_cast %68 : vector<1x1x8x8x4xf32> to vector<1x8x8x4xf32>
    %70 = vector.shape_cast %69 : vector<1x8x8x4xf32> to vector<64x4xf32>
    %c0_68 = arith.constant 0 : index
    %c0_69 = arith.constant 0 : index
    %71 = vector.load %arg6[%c0_68, %c0_69] : memref<64x32xf32, #tpu.memory_space<vmem>>, vector<64x32xf32>
    %c2_70 = arith.constant 2 : index
    %c0_71 = arith.constant 0 : index
    %c0_72 = arith.constant 0 : index
    %c0_73 = arith.constant 0 : index
    %72 = vector.load %arg2[%c2_70, %c0_71, %c0_72, %c0_73] : memref<3x3x4x32xbf16, #tpu.memory_space<vmem>>, vector<1x1x4x32xbf16>
    %73 = vector.shape_cast %72 : vector<1x1x4x32xbf16> to vector<4x32xbf16>
    %74 = arith.extf %73 : vector<4x32xbf16> to vector<4x32xf32>
    %cst_74 = arith.constant dense<0.000000e+00> : vector<64x32xf32>
    %75 = tpu.matmul %70, %74, %cst_74 {dimension_numbers = #tpu.dot_dimension_numbers<[1], [0], [0], [1], [0, 0, 1, 1], [], []>} : vector<64x4xf32>, vector<4x32xf32>, vector<64x32xf32> -> vector<64x32xf32>
    %76 = arith.addf %71, %75 : vector<64x32xf32>
    %c0_75 = arith.constant 0 : index
    %c0_76 = arith.constant 0 : index
    %77 = vector.load %arg6[%c0_75, %c0_76] : memref<64x32xf32, #tpu.memory_space<vmem>>, vector<64x32xf32>
    tpu.vector_store %arg6[%c0_75, %c0_76], %76 {strides = array<i32>} : memref<64x32xf32, #tpu.memory_space<vmem>>, vector<64x32xf32>,
    %78 = vector.extract_strided_slice %67 {offsets = [0, 1, 0, 0, 0], sizes = [1, 1, 8, 8, 4], strides = [1, 1, 1, 1, 1]} : vector<1x2x8x9x4xf32> to vector<1x1x8x8x4xf32>
    %79 = vector.shape_cast %78 : vector<1x1x8x8x4xf32> to vector<1x8x8x4xf32>
    %80 = vector.shape_cast %79 : vector<1x8x8x4xf32> to vector<64x4xf32>
    %c0_77 = arith.constant 0 : index
    %c0_78 = arith.constant 0 : index
    %81 = vector.load %arg6[%c0_77, %c0_78] : memref<64x32xf32, #tpu.memory_space<vmem>>, vector<64x32xf32>
    %c2_79 = arith.constant 2 : index
    %c1_80 = arith.constant 1 : index
    %c0_81 = arith.constant 0 : index
    %c0_82 = arith.constant 0 : index
    %82 = vector.load %arg2[%c2_79, %c1_80, %c0_81, %c0_82] : memref<3x3x4x32xbf16, #tpu.memory_space<vmem>>, vector<1x1x4x32xbf16>
    %83 = vector.shape_cast %82 : vector<1x1x4x32xbf16> to vector<4x32xbf16>
    %84 = arith.extf %83 : vector<4x32xbf16> to vector<4x32xf32>
    %cst_83 = arith.constant dense<0.000000e+00> : vector<64x32xf32>
    %85 = tpu.matmul %80, %84, %cst_83 {dimension_numbers = #tpu.dot_dimension_numbers<[1], [0], [0], [1], [0, 0, 1, 1], [], []>} : vector<64x4xf32>, vector<4x32xf32>, vector<64x32xf32> -> vector<64x32xf32>
    %86 = arith.addf %81, %85 : vector<64x32xf32>
    %c0_84 = arith.constant 0 : index
    %c0_85 = arith.constant 0 : index
    %87 = vector.load %arg6[%c0_84, %c0_85] : memref<64x32xf32, #tpu.memory_space<vmem>>, vector<64x32xf32>
    tpu.vector_store %arg6[%c0_84, %c0_85], %86 {strides = array<i32>} : memref<64x32xf32, #tpu.memory_space<vmem>>, vector<64x32xf32>,
    %88 = vector.extract_strided_slice %67 {offsets = [0, 0, 0, 1, 0], sizes = [1, 1, 8, 8, 4], strides = [1, 1, 1, 1, 1]} : vector<1x2x8x9x4xf32> to vector<1x1x8x8x4xf32>
    %89 = vector.shape_cast %88 : vector<1x1x8x8x4xf32> to vector<1x8x8x4xf32>
    %90 = vector.shape_cast %89 : vector<1x8x8x4xf32> to vector<64x4xf32>
    %c0_86 = arith.constant 0 : index
    %c0_87 = arith.constant 0 : index
    %91 = vector.load %arg6[%c0_86, %c0_87] : memref<64x32xf32, #tpu.memory_space<vmem>>, vector<64x32xf32>
    %c2_88 = arith.constant 2 : index
    %c2_89 = arith.constant 2 : index
    %c0_90 = arith.constant 0 : index
    %c0_91 = arith.constant 0 : index
    %92 = vector.load %arg2[%c2_88, %c2_89, %c0_90, %c0_91] : memref<3x3x4x32xbf16, #tpu.memory_space<vmem>>, vector<1x1x4x32xbf16>
    %93 = vector.shape_cast %92 : vector<1x1x4x32xbf16> to vector<4x32xbf16>
    %94 = arith.extf %93 : vector<4x32xbf16> to vector<4x32xf32>
    %cst_92 = arith.constant dense<0.000000e+00> : vector<64x32xf32>
    %95 = tpu.matmul %90, %94, %cst_92 {dimension_numbers = #tpu.dot_dimension_numbers<[1], [0], [0], [1], [0, 0, 1, 1], [], []>} : vector<64x4xf32>, vector<4x32xf32>, vector<64x32xf32> -> vector<64x32xf32>
    %96 = arith.addf %91, %95 : vector<64x32xf32>
    %c0_93 = arith.constant 0 : index
    %c0_94 = arith.constant 0 : index
    %97 = vector.load %arg6[%c0_93, %c0_94] : memref<64x32xf32, #tpu.memory_space<vmem>>, vector<64x32xf32>
    tpu.vector_store %arg6[%c0_93, %c0_94], %96 {strides = array<i32>} : memref<64x32xf32, #tpu.memory_space<vmem>>, vector<64x32xf32>,
    %c0_95 = arith.constant 0 : index
    %c0_96 = arith.constant 0 : index
    %98 = vector.load %arg6[%c0_95, %c0_96] : memref<64x32xf32, #tpu.memory_space<vmem>>, vector<64x32xf32>
    %c0_97 = arith.constant 0 : index
    %c0_98 = arith.constant 0 : index
    %99 = vector.load %arg3[%c0_97, %c0_98] : memref<1x32xf32, #tpu.memory_space<vmem>>, vector<1x32xf32>
    %100 = vector.broadcast %99 : vector<1x32xf32> to vector<64x32xf32>
    %101 = arith.addf %98, %100 : vector<64x32xf32>
    %102 = arith.mulf %101, %101 : vector<64x32xf32>
    %c0_99 = arith.constant 0 : index
    %c0_100 = arith.constant 0 : index
    %103 = vector.load %arg4[%c0_99, %c0_100] : memref<32x32xf32, #tpu.memory_space<vmem>>, vector<32x32xf32>
    %cst_101 = arith.constant dense<0.000000e+00> : vector<64x32xf32>
    %104 = tpu.matmul %102, %103, %cst_101 {dimension_numbers = #tpu.dot_dimension_numbers<[1], [0], [0], [1], [0, 0, 1, 1], [], []>} : vector<64x32xf32>, vector<32x32xf32>, vector<64x32xf32> -> vector<64x32xf32>
    %cst_102 = arith.constant 9.99999996E-13 : f32
    %105 = vector.broadcast %cst_102 : f32 to vector<64x32xf32>
    %106 = arith.addf %104, %105 : vector<64x32xf32>
    %107 = math.rsqrt %106 : vector<64x32xf32>
    %108 = arith.mulf %104, %107 : vector<64x32xf32>
    %cst_103 = arith.constant 1.000000e+00 : f32
    %109 = vector.broadcast %cst_103 : f32 to vector<64x32xf32>
    %110 = arith.addf %109, %104 : vector<64x32xf32>
    %111 = tpu.reciprocal %110 {approx = true} : vector<64x32xf32> -> vector<64x32xf32>
    %112 = arith.mulf %108, %111 : vector<64x32xf32>
    %113 = arith.mulf %101, %112 : vector<64x32xf32>
    %c0_104 = arith.constant 0 : index
    %c0_105 = arith.constant 0 : index
    %114 = vector.load %arg5[%c0_104, %c0_105] : memref<64x32xf32, #tpu.memory_space<vmem>>, vector<64x32xf32>
    tpu.vector_store %arg5[%c0_104, %c0_105], %113 {strides = array<i32>} : memref<64x32xf32, #tpu.memory_space<vmem>>, vector<64x32xf32>,
    return
  }
  func.func @transform_0(%arg0: i32) -> (i32, i32, i32, i32, i32) {
    %c0_i32 = arith.constant 0 : i32
    %c0_i32_0 = arith.constant 0 : i32
    %c0_i32_1 = arith.constant 0 : i32
    %c0_i32_2 = arith.constant 0 : i32
    %c0_i32_3 = arith.constant 0 : i32
    return %arg0, %c0_i32, %c0_i32_0, %c0_i32_1, %c0_i32_2 : i32, i32, i32, i32, i32
  }
  func.func @transform_1(%arg0: i32) -> (i32, i32, i32, i32) {
    %c0_i32 = arith.constant 0 : i32
    %c0_i32_0 = arith.constant 0 : i32
    %c0_i32_1 = arith.constant 0 : i32
    %c0_i32_2 = arith.constant 0 : i32
    %c0_i32_3 = arith.constant 0 : i32
    return %c0_i32, %c0_i32_0, %c0_i32_1, %c0_i32_2 : i32, i32, i32, i32
  }
  func.func @transform_2(%arg0: i32) -> (i32, i32) {
    %c0_i32 = arith.constant 0 : i32
    %c0_i32_0 = arith.constant 0 : i32
    %c0_i32_1 = arith.constant 0 : i32
    return %c0_i32, %c0_i32_0 : i32, i32
  }
  func.func @transform_3(%arg0: i32) -> (i32, i32) {
    %c0_i32 = arith.constant 0 : i32
    %c0_i32_0 = arith.constant 0 : i32
    %c0_i32_1 = arith.constant 0 : i32
    return %c0_i32, %c0_i32_0 : i32, i32
  }
  func.func @transform_4(%arg0: i32) -> (i32, i32) {
    %c0_i32 = arith.constant 0 : i32
    %c0_i32_0 = arith.constant 0 : i32
    return %arg0, %c0_i32 : i32, i32
  }
}

</mosaic_0001>

<bundles_post_ra>
// kernel: primary_caps_forward.1
= control target key start
LH: loop header
LB: loop body
LE: loop exit
PB: predicated region body
PF: predicated region fallthrough
CT: control target
= control target key end

     0   :  { %s2622_s15 = smov 0   ;;  %s3079_s0 = inlined_call_operand.vmem [shape: bf16[2,4,9,9,4], index: 0, kind: input, shape index: {}]   ;;  %s3080_s1 = inlined_call_operand.vmem [shape: bf16[3,3,4,32], index: 1, kind: input, shape index: {}]   ;;  %s3081_s2 = inlined_call_operand.vmem [shape: f32[1,32], index: 2, kind: input, shape index: {}]   ;;  %s3082_s3 = inlined_call_operand.vmem [shape: f32[32,32], index: 3, kind: input, shape index: {}]   ;;  %s3083_s4 = inlined_call_operand.vmem [shape: f32[128,32], index: 4, kind: output, shape index: {}]  }
   0x1 LB: > { %s2628_s16 = sadd.s32 4294967295, %s2594_s15   ;;  %p2147_p0 = scmp.ge.s32.totalorder %s2594_s15, 1  ;;  %s2594_s15 = sphi %s2622_s15, %s14_s15  }
   0x2   : > { %p162_p1 = scmp.lt.s32.totalorder %s2594_s15, 3 }
   0x4   : > { %p163_p2 = pnand %p2147_p0, %p162_p1 }
   0x5   : > { %v264_v0 = vld [vmem:[%s3080_s1] sm:$0x3] (!%p163_p2)  ;;  %vm291_vm0 = vcmask (!%p163_p2), 1043456   ;;  %p188_p3 = scmp.lt.s32.totalorder (!%p163_p2), %s2628_s16, 1  ;;  %v2170_v2 = vld [vmem:[%s3080_s1 + $0x4] sm:$0x3] (!%p163_p2) }
   0x6   : > { %166 = sbr.rel (%p163_p2) target bundleno = 576 (0x240), region = 36  ;;  %v265_v1 = vunpack.c.l.bf16 (!%p163_p2), %v264_v0  ;;  %v2160_v3 = vld [vmem:[%s3080_s1 + $0x2] sm:$0x3] (!%p163_p2)  ;;  %v2204_v4 = vld [vmem:[%s3080_s1 + $0x6] sm:$0x3] (!%p163_p2)  ;;  %v618_v5 = vunpack.c.l.bf16 (!%p163_p2), %v2170_v2  ;;  %vm199_vm1 = vcmask (!%p163_p2), 261120  }
   0x7   : > { %v426_v6 = vunpack.c.l.bf16 (!%p163_p2), %v2160_v3  ;;  %v818_v7 = vunpack.c.l.bf16 (!%p163_p2), %v2204_v4  ;;  %v2596_v8 = vmov (!%p163_p2), 0.0   ;;  %v2668_v9 = vld [vmem:[%s3080_s1 + $0x8] sm:$0x3] (!%p163_p2)  ;;  %vm266_vm2 = vcmask (!%p163_p2), 31744   ;;  %v2680_v17 = vld [vmem:[%s3080_s1 + $0xa] sm:$0x3] (!%p163_p2) }
   0x8   : > { %2392 = vmatprep.subr.msk.mxu0 (!%p163_p2), %vm291_vm0, %v265_v1  ;;  %201 = vst.msk [vmem:[#allocation2 + $0x8] sm:$0xff] (!%p163_p2), %vm199_vm1, %v2596_v8  ;;  %200 = vst.msk [vmem:[#allocation2] sm:$0xff] (!%p163_p2), %vm199_vm1, %v2596_v8  ;;  %v977_v21 = vunpack.c.l.bf16 (!%p163_p2), %v2668_v9  ;;  %v1168_v26 = vunpack.c.l.bf16 (!%p163_p2), %v2680_v17  ;;  %vm583_vm3 = vcmask (!%p163_p2), 1046528   ;;  %v2728_v51 = vld [vmem:[%s3080_s1 + $0xc] sm:$0x3] (!%p163_p2) }
   0x9   : > { %2393 = vmatpush3.msk.msra.mxu0 (!%p163_p2), %vm291_vm0, %v265_v1  ;;  %2406 = vmatprep.subr.msk.mxu1 (!%p163_p2), %vm291_vm0, %v426_v6  ;;  %202 = vst.msk [vmem:[#allocation2 + $0x10] sm:$0xff] (!%p163_p2), %vm199_vm1, %v2596_v8  ;;  %203 = vst.msk [vmem:[#allocation2 + $0x18] sm:$0xff] (!%p163_p2), %vm199_vm1, %v2596_v8  ;;  %v1368_v61 = vunpack.c.l.bf16 (!%p163_p2), %v2728_v51  ;;  %v2746_v2 = vld [vmem:[%s3080_s1 + $0xe] sm:$0x3] (!%p163_p2) }
   0xa   : > { %2420 = vmatprep.subr.msk.mxu0 (!%p163_p2), %vm291_vm0, %v618_v5  ;;  %2407 = vmatpush3.msk.msra.mxu1 (!%p163_p2), %vm291_vm0, %v426_v6  ;;  %204 = vst.msk [vmem:[#allocation2 + $0x20] sm:$0xff] (!%p163_p2), %vm199_vm1, %v2596_v8  ;;  %205 = vst.msk [vmem:[#allocation2 + $0x28] sm:$0xff] (!%p163_p2), %vm199_vm1, %v2596_v8 }
   0xb   : > { %206 = vst.msk [vmem:[#allocation2 + $0x30] sm:$0xff] (!%p163_p2), %vm199_vm1, %v2596_v8  ;;  %207 = vst.msk [vmem:[#allocation2 + $0x38] sm:$0xff] (!%p163_p2), %vm199_vm1, %v2596_v8  ;;  %2434 = vmatprep.subr.msk.mxu1 (!%p163_p2), %vm291_vm0, %v818_v7 }
   0xd   : > { %s189_s25 = scalar_select %p188_p3, %s2628_s16, 1 }
   0xf   : > { %s2546_s26 = smul.u32 288, %s189_s25 }
  0x11   : > { %s2662_s29 = scalar_lea.vmem %s3079_s0, %s2546_s26  ;;  %s2149_s26 = sshll.u32 %s2628_s16, 3 }
  0x12   : > { %v208_v10 = vld [vmem:[%s2662_s29] ss:$8 sps:$4 sm:$0xff]   ;;  %v2672_v11 = vld [vmem:[%s2662_s29 + $0x10] ss:$8 sps:$4 sm:$0xff]   ;;  %v209_v22 = vld [vmem:[%s2662_s29 + $0x4] sm:$0x1] }
  0x13   : > { %v232_v12 = vunpack.c.l.bf16 %v208_v10  ;;  %v234_v13 = vunpack.c.h.bf16 %v208_v10  ;;  %v236_v14 = vunpack.c.l.bf16 %v2672_v11  ;;  %v224_v15 = vld [vmem:[%s2662_s29 + $0x48] ss:$8 sps:$4 sm:$0xff]   ;;  %v226_v16 = vld [vmem:[%s2662_s29 + $0x58] ss:$8 sps:$4 sm:$0xff]   ;;  %v238_v23 = vunpack.c.h.bf16 %v2672_v11  ;;  %v211_v31 = vld [vmem:[%s2662_s29 + $0xc] sm:$0x1] }
  0x14   : > { %v2683_v18 = vld [vmem:[%s2662_s29 + $0x20] ss:$8 sps:$4 sm:$0xff]   ;;  %v248_v19 = vunpack.c.l.bf16 %v224_v15  ;;  %v249_v20 = vunpack.c.h.bf16 %v224_v15  ;;  %v250_v24 = vunpack.c.l.bf16 %v226_v16  ;;  %v2698_v28 = vld [vmem:[%s2662_s29 + $0x30] ss:$8 sps:$4 sm:$0xff]   ;;  %v251_v29 = vunpack.c.h.bf16 %v226_v16  ;;  %v213_v33 = vld [vmem:[%s2662_s29 + $0x14] sm:$0x1] }
  0x15   : > { %2394 = vmatprep.mubr.msk.f32.mxu0 %vm266_vm2, %v232_v12  ;;  %v228_v25 = vld [vmem:[%s2662_s29 + $0x68] ss:$8 sps:$4 sm:$0xff]   ;;  %v240_v27 = vunpack.c.l.bf16 %v2683_v18  ;;  %v233_v30 = vunpack.c.l.bf16 %v209_v22  ;;  %v242_v34 = vunpack.c.h.bf16 %v2683_v18  ;;  %v230_v35 = vld [vmem:[%s2662_s29 + $0x78] ss:$8 sps:$4 sm:$0xff]   ;;  %v244_v36 = vunpack.c.l.bf16 %v2698_v28  ;;  %v215_v42 = vld [vmem:[%s2662_s29 + $0x1c] sm:$0x1] }
  0x16   : > { %2395 = vmatmul.mubr.msk.f32.vlgmr.msra.gmra.mrb[0].mxu0 %vm266_vm2, %v234_v13  ;;  %2408 = vmatprep.mubr.msk.f32.mxu1 %vm266_vm2, %v248_v19  ;;  %v252_v32 = vunpack.c.l.bf16 %v228_v25  ;;  %v235_v37 = vunpack.c.l.bf16 %v211_v31  ;;  %v584_v38 = vrot.slane %v232_v12, 1  ;;  %v253_v39 = vunpack.c.h.bf16 %v228_v25  ;;  %v217_v44 = vld [vmem:[%s2662_s29 + $0x24] sm:$0x1]  ;;  %v2722_v46 = vld [vmem:[%s2662_s29 + $0x90] ss:$8 sps:$4 sm:$0xff]   ;;  %p194_p4 = scmp.lt.s32.totalorder %s2149_s26, 15 }
  0x17   : > { %2397 = vmatprep.mubr.msk.f32.mxu0 %vm266_vm2, %v236_v14  ;;  %2421 = vmatpush3.msk.msra.mxu0 %vm291_vm0, %v618_v5  ;;  %v585_v40 = vrot.slane %v233_v30, 1  ;;  %v237_v41 = vunpack.c.l.bf16 %v213_v33  ;;  %v254_v43 = vunpack.c.l.bf16 %v230_v35  ;;  %v246_v45 = vunpack.c.h.bf16 %v2698_v28  ;;  %v219_v56 = vld [vmem:[%s2662_s29 + $0x2c] sm:$0x1]  ;;  %v221_v58 = vld [vmem:[%s2662_s29 + $0x34] sm:$0x1] }
  0x18   : > { %2409 = vmatmul.mubr.msk.f32.vlgmr.msra.gmra.mrb[0].mxu1 %vm266_vm2, %v249_v20  ;;  %2448 = vmatprep.subr.msk.mxu0 %vm291_vm0, %v977_v21  ;;  %v587_v47 = vrot.slane %v234_v13, 1  ;;  %v588_v48 = vrot.slane %v235_v37, 1  ;;  %v255_v49 = vunpack.c.h.bf16 %v230_v35  ;;  %v239_v50 = vunpack.c.l.bf16 %v215_v42  ;;  %v2738_v60 = vld [vmem:[%s2662_s29 + $0xa0] ss:$8 sps:$4 sm:$0xff]   ;;  %v2756_v10 = vld [vmem:[%s2662_s29 + $0xb0] ss:$8 sps:$4 sm:$0xff]  }
  0x19   : > { %2411 = vmatprep.mubr.msk.f32.mxu1 %vm266_vm2, %v250_v24  ;;  %2435 = vmatpush3.msk.msra.mxu1 %vm291_vm0, %v818_v7  ;;  %v586_v52 = vsel %vm583_vm3, %v584_v38, %v585_v40  ;;  %v590_v53 = vrot.slane %v236_v14, 1  ;;  %v591_v54 = vrot.slane %v237_v41, 1  ;;  %v241_v55 = vunpack.c.l.bf16 %v217_v44  ;;  %v223_v7 = vld [vmem:[%s2662_s29 + $0x3c] sm:$0x1]  ;;  %v2181_v16 = vld [vmem:[%s2662_s29 + $0x94] sm:$0x1] }
  0x1a   : > { %2398 = vmatmul.mubr.msk.f32.gmra.mrb[2].mxu0 %vm266_vm2, %v238_v23  ;;  %2462 = vmatprep.subr.msk.mxu1 %vm291_vm0, %v1168_v26  ;;  %v784_v57 = vunpack.c.l.bf16 %v2722_v46  ;;  %v593_v59 = vrot.slane %v238_v23, 1  ;;  %v589_v62 = vsel %vm583_vm3, %v587_v47, %v588_v48  ;;  %v594_v63 = vrot.slane %v239_v50, 1  ;;  %v2183_v24 = vld [vmem:[%s2662_s29 + $0x9c] sm:$0x1]  ;;  %v2196_v30 = vld [vmem:[%s2662_s29 + $0xd8] ss:$8 sps:$4 sm:$0xff]  }
  0x1b   : > { %2400 = vmatprep.mubr.msk.f32.mxu0 %vm266_vm2, %v240_v27  ;;  %v596_v0 = vrot.slane %v240_v27, 1  ;;  %v243_v1 = vunpack.c.l.bf16 %v219_v56  ;;  %v592_v3 = vsel %vm583_vm3, %v590_v53, %v591_v54  ;;  %v597_v4 = vrot.slane %v241_v55, 1  ;;  %v2198_v41 = vld [vmem:[%s2662_s29 + $0xe8] ss:$8 sps:$4 sm:$0xff]   ;;  %v2193_v54 = vld [vmem:[%s2662_s29 + $0xc4] sm:$0x1] }
  0x1c   : > { %2412 = vmatmul.mubr.msk.f32.gmra.mrb[2].mxu1 %vm266_vm2, %v251_v29  ;;  %v786_v5 = vunpack.c.h.bf16 %v2722_v46  ;;  %v245_v6 = vunpack.c.l.bf16 %v221_v58  ;;  %v788_v8 = vunpack.c.l.bf16 %v2738_v60  ;;  %v1527_v11 = vunpack.c.l.bf16 %v2746_v2  ;;  %v2805_v46 = vld [vmem:[%s3080_s1 + $0x10] sm:$0x3]  ;;  %v2200_v56 = vld [vmem:[%s2662_s29 + $0xf8] ss:$8 sps:$4 sm:$0xff]   ;;  %s3085_s26 = smov (!%p194_p4, %s2149_s26), 15 }
  0x1d   : > { %2414 = vmatprep.mubr.msk.f32.mxu1 %vm266_vm2, %v252_v32  ;;  %v595_v12 = vsel %vm583_vm3, %v593_v59, %v594_v63  ;;  %v599_v13 = vrot.slane %v242_v34, 1  ;;  %v600_v14 = vrot.slane %v243_v1, 1  ;;  %v247_v15 = vunpack.c.l.bf16 %v223_v7  ;;  %v2234_v2 = vld [vmem:[%s2662_s29 + $0x8] ss:$8 sps:$4 sm:$0xff]   ;;  %s2150_s16 = sshll.u32 %s3085_s26, 3 }
  0x1e   : > { %2401 = vmatmul.mubr.msk.f32.gmra.mrb[4].mxu0 %vm266_vm2, %v242_v34  ;;  %v598_v18 = vsel %vm583_vm3, %v596_v0, %v597_v4  ;;  %v602_v19 = vrot.slane %v244_v36, 1  ;;  %v603_v20 = vrot.slane %v245_v6, 1  ;;  %v790_v22 = vunpack.c.h.bf16 %v2738_v60  ;;  %v2195_v4 = vld [vmem:[%s2662_s29 + $0xcc] sm:$0x1]  ;;  %v2202_v6 = vld [vmem:[%s2662_s29 + $0x108] ss:$8 sps:$4 sm:$0xff]  }
  0x1f   : > { %2403 = vmatprep.mubr.msk.f32.mxu0 %vm266_vm2, %v244_v36  ;;  %v792_v9 = vunpack.c.l.bf16 %v2756_v10  ;;  %v785_v23 = vunpack.c.l.bf16 %v2181_v16  ;;  %v601_v17 = vsel %vm583_vm3, %v599_v13, %v600_v14  ;;  %v605_v25 = vrot.slane %v246_v45, 1  ;;  %v2187_v36 = vld [vmem:[%s2662_s29 + $0xac] sm:$0x1] }
  0x20   : > { %2415 = vmatmul.mubr.msk.f32.gmra.mrb[4].mxu1 %vm266_vm2, %v253_v39  ;;  %v606_v27 = vrot.slane %v247_v15, 1  ;;  %v604_v28 = vsel %vm583_vm3, %v602_v19, %v603_v20  ;;  %v794_v29 = vunpack.c.h.bf16 %v2756_v10  ;;  %v787_v32 = vunpack.c.l.bf16 %v2183_v24  ;;  %v2189_v39 = vld [vmem:[%s2662_s29 + $0xb4] sm:$0x1] }
  0x21   : > { %2417 = vmatprep.mubr.msk.f32.mxu1 %vm266_vm2, %v254_v43  ;;  %v1134_v33 = vrot.slane %v784_v57, 1  ;;  %v1135_v34 = vrot.slane %v785_v23, 1  ;;  %v800_v38 = vunpack.c.l.bf16 %v2196_v30  ;;  %v801_v42 = vunpack.c.h.bf16 %v2196_v30  ;;  %v2235_v30 = vld [vmem:[%s2662_s29 + $0xc] sm:$0x1] }
  0x22   : > { %2404 = vmatmul.mubr.msk.f32.gmra.mrb[6].mxu0 %vm266_vm2, %v246_v45  ;;  %v607_v37 = vsel %vm583_vm3, %v605_v25, %v606_v27  ;;  %v1137_v43 = vrot.slane %v786_v5, 1  ;;  %v1138_v44 = vrot.slane %v787_v32, 1  ;;  %v791_v45 = vunpack.c.l.bf16 %v2187_v36  ;;  %v2252_v25 = vld [vmem:[%s2662_s29 + $0x60] ss:$8 sps:$4 sm:$0xff]   ;;  %v2254_v32 = vld [vmem:[%s2662_s29 + $0x70] ss:$8 sps:$4 sm:$0xff]  }
  0x23   : > { %2422 = vmatprep.mubr.msk.f32.mxu0 %vm266_vm2, %v586_v52  ;;  %v1136_v47 = vsel %vm583_vm3, %v1134_v33, %v1135_v34  ;;  %v1140_v48 = vrot.slane %v788_v8, 1  ;;  %v793_v50 = vunpack.c.l.bf16 %v2189_v39  ;;  %v2191_v52 = vld [vmem:[%s2662_s29 + $0xbc] sm:$0x1]  ;;  %v802_v53 = vunpack.c.l.bf16 %v2198_v41  ;;  %v2246_v34 = vld [vmem:[%s2662_s29 + $0x38] ss:$8 sps:$4 sm:$0xff]  }
  0x24   : > { %2418 = vmatmul.mubr.msk.f32.gmra.mrb[6].mxu1 %vm266_vm2, %v255_v49  ;;  %v803_v55 = vunpack.c.h.bf16 %v2198_v41  ;;  %v1139_v58 = vsel %vm583_vm3, %v1137_v43, %v1138_v44  ;;  %v1143_v59 = vrot.slane %v790_v22, 1  ;;  %v1144_v60 = vrot.slane %v791_v45, 1  ;;  %v2239_v39 = vld [vmem:[%s2662_s29 + $0x1c] sm:$0x1]  ;;  %v2256_v41 = vld [vmem:[%s2662_s29 + $0x80] ss:$8 sps:$4 sm:$0xff]  }
  0x25   : > { %2436 = vmatprep.mubr.msk.f32.mxu1 %vm266_vm2, %v784_v57  ;;  %v1718_v57 = vunpack.c.l.bf16 %v2805_v46  ;;  %v1146_v0 = vrot.slane %v792_v9, 1  ;;  %v1147_v1 = vrot.slane %v793_v50, 1  ;;  %v1149_v51 = vrot.slane %v794_v29, 1  ;;  %v2243_v50 = vld [vmem:[%s2662_s29 + $0x2c] sm:$0x1] }
  0x26   : > { %2423 = vmatmul.mubr.msk.f32.vlgmr.msra.gmra.mrb[8].mxu0 %vm266_vm2, %v589_v62  ;;  %v795_v62 = vunpack.c.l.bf16 %v2191_v52  ;;  %v1145_v7 = vsel %vm583_vm3, %v1143_v59, %v1144_v60  ;;  %v805_v10 = vunpack.c.h.bf16 %v2200_v56  ;;  %v806_v15 = vunpack.c.l.bf16 %v2202_v6 }
  0x27   : > { %2425 = vmatprep.mubr.msk.f32.mxu0 %vm266_vm2, %v592_v3  ;;  %2449 = vmatpush3.msk.msra.mxu0 %vm291_vm0, %v977_v21  ;;  %v2778_v21 = vld [vmem:[%s2662_s29 + $0xc0] ss:$8 sps:$4 sm:$0xff]   ;;  %v797_v3 = vunpack.c.l.bf16 %v2193_v54  ;;  %v807_v19 = vunpack.c.h.bf16 %v2202_v6  ;;  %v1335_v36 = vunpack.c.l.bf16 %v2235_v30  ;;  %v1355_v44 = vunpack.c.h.bf16 %v2254_v32 }
  0x28   : > { %2437 = vmatmul.mubr.msk.f32.vlgmr.msra.gmra.mrb[8].mxu1 %vm266_vm2, %v786_v5  ;;  %2476 = vmatprep.subr.msk.mxu0 %vm291_vm0, %v1368_v61  ;;  %v796_v31 = vunpack.c.l.bf16 %v2778_v21  ;;  %v798_v40 = vunpack.c.h.bf16 %v2778_v21  ;;  %v804_v5 = vunpack.c.l.bf16 %v2200_v56  ;;  %v2847_v21 = vld [vmem:[%s2662_s29 + $0x18] ss:$8 sps:$4 sm:$0xff]   ;;  %v1348_v52 = vunpack.c.h.bf16 %v2246_v34 }
  0x29   : > { %2439 = vmatprep.mubr.msk.f32.mxu1 %vm266_vm2, %v788_v8  ;;  %2463 = vmatpush3.msk.msra.mxu1 %vm291_vm0, %v1168_v26  ;;  %v2185_v26 = vld [vmem:[%s2662_s29 + $0xa4] sm:$0x1]  ;;  %v1150_v8 = vrot.slane %v795_v62, 1  ;;  %v1153_v14 = vrot.slane %v797_v3, 1  ;;  %v1338_v27 = vunpack.c.l.bf16 %v2847_v21  ;;  %v1685_v46 = vrot.slane %v1335_v36, 1 }
  0x2a   : > { %2426 = vmatmul.mubr.msk.f32.gmra.mrb[10].mxu0 %vm266_vm2, %v595_v12  ;;  %2490 = vmatprep.subr.msk.mxu1 %vm291_vm0, %v1527_v11  ;;  %v789_v35 = vunpack.c.l.bf16 %v2185_v26  ;;  %v1148_v12 = vsel %vm583_vm3, %v1146_v0, %v1147_v1  ;;  %v1152_v13 = vrot.slane %v796_v31, 1  ;;  %v1155_v16 = vrot.slane %v798_v40, 1  ;;  %v2857_v26 = vld [vmem:[%s2662_s29 + $0x28] ss:$8 sps:$4 sm:$0xff]   ;;  %v2245_v62 = vld [vmem:[%s2662_s29 + $0x34] sm:$0x1] }
  0x2b   : > { %2428 = vmatprep.mubr.msk.f32.mxu0 %vm266_vm2, %v598_v18  ;;  %v1342_v33 = vunpack.c.l.bf16 %v2857_v26  ;;  %v1343_v60 = vunpack.c.l.bf16 %v2243_v50 }
  0x2c   : > { %2440 = vmatmul.mubr.msk.f32.gmra.mrb[10].mxu1 %vm266_vm2, %v790_v22  ;;  %v1141_v49 = vrot.slane %v789_v35, 1  ;;  %v1154_v20 = vsel %vm583_vm3, %v1152_v13, %v1153_v14  ;;  %v2250_v22 = vld [vmem:[%s2662_s29 + $0x50] ss:$8 sps:$4 sm:$0xff]   ;;  %v1353_v35 = vunpack.c.h.bf16 %v2252_v25 }
  0x2d   : > { %2442 = vmatprep.mubr.msk.f32.mxu1 %vm266_vm2, %v792_v9  ;;  %v1334_v9 = vunpack.c.l.bf16 %v2234_v2  ;;  %v1350_v24 = vunpack.c.l.bf16 %v2250_v22  ;;  %v1696_v6 = vrot.slane %v1342_v33, 1 }
  0x2e   : > { %2429 = vmatmul.mubr.msk.f32.gmra.mrb[12].mxu0 %vm266_vm2, %v601_v17  ;;  %v1142_v63 = vsel %vm583_vm3, %v1140_v48, %v1141_v49  ;;  %v1336_v17 = vunpack.c.h.bf16 %v2234_v2  ;;  %v2241_v48 = vld [vmem:[%s2662_s29 + $0x24] sm:$0x1]  ;;  %v1356_v49 = vunpack.c.l.bf16 %v2256_v41 }
  0x2f   : > { %2431 = vmatprep.mubr.msk.f32.mxu0 %vm266_vm2, %v604_v28  ;;  %v1351_v28 = vunpack.c.h.bf16 %v2250_v22  ;;  %v1684_v45 = vrot.slane %v1334_v9, 1  ;;  %v1341_v56 = vunpack.c.l.bf16 %v2241_v48  ;;  %v1890_v22 = vld [vmem:[%s3082_s3] sm:$0xff]  ;;  %v263_v48 = vld [vmem:[#allocation2 + $0x38] sm:$0xff] }
  0x30   : > { %2443 = vmatmul.mubr.msk.f32.gmra.mrb[12].mxu1 %vm266_vm2, %v794_v29  ;;  %v1352_v29 = vunpack.c.l.bf16 %v2252_v25  ;;  %v257_v25 = vld [vmem:[#allocation2 + $0x8] sm:$0xff] }
  0x31   : > { %2445 = vmatprep.mubr.msk.f32.mxu1 %vm266_vm2, %v796_v31  ;;  %v1340_v31 = vunpack.c.h.bf16 %v2847_v21  ;;  %v1694_v3 = vrot.slane %v1341_v56, 1 }
  0x32   : > { %2432 = vmatmul.mubr.msk.f32.gmra.mrb[14].mxu0 %vm266_vm2, %v607_v37  ;;  %v2237_v37 = vld [vmem:[%s2662_s29 + $0x14] sm:$0x1] }
  0x33   : > { %2450 = vmatprep.mubr.msk.f32.mxu0 %vm266_vm2, %v800_v38  ;;  %v1354_v38 = vunpack.c.l.bf16 %v2254_v32  ;;  %v1337_v43 = vunpack.c.l.bf16 %v2237_v37  ;;  %v1693_v1 = vrot.slane %v1340_v31, 1 }
  0x34   : > { %2446 = vmatmul.mubr.msk.f32.gmra.mrb[14].mxu1 %vm266_vm2, %v798_v40  ;;  %v1344_v40 = vunpack.c.h.bf16 %v2857_v26 }
  0x35   : > { %2464 = vmatprep.mubr.msk.f32.mxu1 %vm266_vm2, %v1136_v47  ;;  %v1339_v47 = vunpack.c.l.bf16 %v2239_v39  ;;  %v1688_v54 = vrot.slane %v1337_v43, 1  ;;  %v261_v39 = vld [vmem:[#allocation2 + $0x28] sm:$0xff] }
  0x36   : > { %2451 = vmatmul.mubr.msk.f32.vlgmr.msra.gmra.mrb[16].mxu0 %vm266_vm2, %v801_v42  ;;  %v1346_v42 = vunpack.c.l.bf16 %v2246_v34 }
  0x37   : > { %2453 = vmatprep.mubr.msk.f32.mxu0 %vm266_vm2, %v802_v53  ;;  %2477 = vmatpush3.msk.msra.mxu0 %vm291_vm0, %v1368_v61  ;;  %v799_v61 = vunpack.c.l.bf16 %v2195_v4  ;;  %v1687_v53 = vrot.slane %v1336_v17, 1  ;;  %v1691_v59 = vrot.slane %v1339_v47, 1  ;;  %v1345_v4 = vunpack.c.l.bf16 %v2245_v62 }
  0x38   : > { %2465 = vmatmul.mubr.msk.f32.vlgmr.msra.gmra.mrb[16].mxu1 %vm266_vm2, %v1139_v58  ;;  %2504 = vmatprep.subr.msk.mxu0 %vm291_vm0, %v1718_v57  ;;  %v1690_v58 = vrot.slane %v1338_v27, 1 }
  0x39   : > { %2467 = vmatprep.mubr.msk.f32.mxu1 %vm266_vm2, %v1142_v63  ;;  %2491 = vmatpush3.msk.msra.mxu1 %vm291_vm0, %v1527_v11  ;;  %v1151_v11 = vsel %vm583_vm3, %v1149_v51, %v1150_v8  ;;  %v1156_v18 = vrot.slane %v799_v61, 1  ;;  %v2247_v63 = vld [vmem:[%s2662_s29 + $0x3c] sm:$0x1]  ;;  %v1689_v0 = vsel %vm583_vm3, %v1687_v53, %v1688_v54  ;;  %v2249_v8 = vld [vmem:[%s2662_s29 + $0x44] sm:$0x1]  ;;  %v1695_v61 = vsel %vm583_vm3, %v1693_v1, %v1694_v3  ;;  %v262_v53 = vld [vmem:[#allocation2 + $0x30] sm:$0xff]  ;;  %s3050_s29 = scalar_lea.vmem %s3083_s4, %s2150_s16 }
  0x3a   : > { %2454 = vmatmul.mubr.msk.f32.gmra.mrb[18].mxu0 %vm266_vm2, %v803_v55  ;;  %v1357_v55 = vunpack.c.h.bf16 %v2256_v41  ;;  %v1347_v51 = vunpack.c.l.bf16 %v2247_v63  ;;  %v1349_v13 = vunpack.c.l.bf16 %v2249_v8  ;;  %v260_v41 = vld [vmem:[#allocation2 + $0x20] sm:$0xff] }
  0x3b   : > { %2456 = vmatprep.mubr.msk.f32.mxu0 %vm266_vm2, %v804_v5  ;;  %v1157_v23 = vsel %vm583_vm3, %v1155_v16, %v1156_v18  ;;  %v1692_v5 = vsel %vm583_vm3, %v1690_v58, %v1691_v59  ;;  %v1705_v16 = vrot.slane %v1348_v52, 1 }
  0x3c   : > { %2468 = vmatmul.mubr.msk.f32.gmra.mrb[18].mxu1 %vm266_vm2, %v1145_v7  ;;  %v1697_v7 = vrot.slane %v1343_v60, 1  ;;  %v1703_v2 = vrot.slane %v1347_v51, 1  ;;  %v1706_v18 = vrot.slane %v1349_v13, 1 }
  0x3d   : > { %2470 = vmatprep.mubr.msk.f32.mxu1 %vm266_vm2, %v1148_v12  ;;  %v1700_v12 = vrot.slane %v1345_v4, 1 }
  0x3e   : > { %2457 = vmatmul.mubr.msk.f32.gmra.mrb[20].mxu0 %vm266_vm2, %v805_v10  ;;  %v1699_v10 = vrot.slane %v1344_v40, 1  ;;  %v1698_v14 = vsel %vm583_vm3, %v1696_v6, %v1697_v7 }
  0x3f   : > { %2459 = vmatprep.mubr.msk.f32.mxu0 %vm266_vm2, %v806_v15  ;;  %v1702_v15 = vrot.slane %v1346_v42, 1 }
  0x40   : > { %2471 = vmatmul.mubr.msk.f32.gmra.mrb[20].mxu1 %vm266_vm2, %v1151_v11  ;;  %v1701_v11 = vsel %vm583_vm3, %v1699_v10, %v1700_v12 }
  0x41   : > { %2473 = vmatprep.mubr.msk.f32.mxu1 %vm266_vm2, %v1154_v20  ;;  %v1707_v20 = vsel %vm583_vm3, %v1705_v16, %v1706_v18 }
  0x42   : > { %2460 = vmatmul.mubr.msk.f32.gmra.mrb[22].mxu0 %vm266_vm2, %v807_v19  ;;  %v1704_v19 = vsel %vm583_vm3, %v1702_v15, %v1703_v2 }
  0x43   : > { %2478 = vmatprep.mubr.msk.f32.mxu0 %vm266_vm2, %v1334_v9  ;;  %v1891_v9 = vld [vmem:[%s3082_s3 + $0x8] sm:$0xff] }
  0x44   : > { %2474 = vmatmul.mubr.msk.f32.gmra.mrb[22].mxu1 %vm266_vm2, %v1157_v23  ;;  %v2538_v21 = vpack.c.bf16 %v1891_v9, %v1890_v22  ;;  %v1892_v23 = vld [vmem:[%s3082_s3 + $0x10] sm:$0xff] }
  0x45   : > { %2492 = vmatprep.mubr.msk.f32.mxu1 %vm266_vm2, %v1350_v24  ;;  %v1893_v24 = vld [vmem:[%s3082_s3 + $0x18] sm:$0xff] }
  0x46   : > { %2479 = vmatmul.mubr.msk.f32.vlgmr.msra.gmra.mrb[24].mxu0 %vm266_vm2, %v1336_v17  ;;  %2539 = vmatprep.subr.bf16.mxu1 %v2538_v21  ;;  %v2542_v17 = vpack.c.bf16 %v1893_v24, %v1892_v23 }
  0x47   : > { %2481 = vmatprep.mubr.msk.f32.mxu0 %vm266_vm2, %v1338_v27  ;;  %2505 = vmatpush3.msk.msra.mxu0 %vm291_vm0, %v1718_v57  ;;  %v1686_v57 = vsel %vm583_vm3, %v1684_v45, %v1685_v46  ;;  %v256_v27 = vld [vmem:[#allocation2] sm:$0xff] }
  0x48   : > { %2493 = vmatmul.mubr.msk.f32.vlgmr.msra.gmra.mrb[24].mxu1 %vm266_vm2, %v1351_v28 }
  0x49   : > { %2495 = vmatprep.mubr.msk.f32.mxu1 %vm266_vm2, %v1352_v29  ;;  %2541 = vmatpush3.bf16.msra.mxu1 %v2538_v21 }
  0x4a   : > { %2482 = vmatmul.mubr.msk.f32.gmra.mrb[26].mxu0 %vm266_vm2, %v1340_v31  ;;  %2543 = vmatprep.subr.bf16.mxu1 %v2542_v17  ;;  %v259_v31 = vld [vmem:[#allocation2 + $0x18] sm:$0xff] }
  0x4b   : > { %2484 = vmatprep.mubr.msk.f32.mxu0 %vm266_vm2, %v1342_v33  ;;  %v258_v33 = vld [vmem:[#allocation2 + $0x10] sm:$0xff] }
  0x4c   : > { %2496 = vmatmul.mubr.msk.f32.gmra.mrb[26].mxu1 %vm266_vm2, %v1353_v35 }
  0x4d   : > { %2498 = vmatprep.mubr.msk.f32.mxu1 %vm266_vm2, %v1354_v38  ;;  %2545 = vmatpush3.bf16.msra.mxu1 %v2542_v17 }
  0x4e   : > { %2485 = vmatmul.mubr.msk.f32.gmra.mrb[28].mxu0 %vm266_vm2, %v1344_v40 }
  0x4f   : > { %2487 = vmatprep.mubr.msk.f32.mxu0 %vm266_vm2, %v1346_v42 }
  0x50   : > { %2499 = vmatmul.mubr.msk.f32.gmra.mrb[28].mxu1 %vm266_vm2, %v1355_v44 }
  0x51   : > { %2501 = vmatprep.mubr.msk.f32.mxu1 %vm266_vm2, %v1356_v49 }
  0x52   : > { %2488 = vmatmul.mubr.msk.f32.gmra.mrb[30].mxu0 %vm266_vm2, %v1348_v52 }
  0x53   : > { %2506 = vmatprep.mubr.msk.f32.mxu0 %vm266_vm2, %v1686_v57 }
  0x54   : > { %2502 = vmatmul.mubr.msk.f32.gmra.mrb[30].mxu1 %vm266_vm2, %v1357_v55 }
  0x56   : > { %2507 = vmatmul.mubr.msk.f32.vlgmr.msra.gmra.mrb[32].mxu0 %vm266_vm2, %v1689_v0 }
  0x57   : > { %2509 = vmatprep.mubr.msk.f32.mxu0 %vm266_vm2, %v1692_v5 }
  0x5a   : > { %2510 = vmatmul.mubr.msk.f32.gmra.mrb[34].mxu0 %vm266_vm2, %v1695_v61 }
  0x5b   : > { %2512 = vmatprep.mubr.msk.f32.mxu0 %vm266_vm2, %v1698_v14 }
  0x5e   : > { %2513 = vmatmul.mubr.msk.f32.gmra.mrb[36].mxu0 %vm266_vm2, %v1701_v11 }
  0x5f   : > { %2515 = vmatprep.mubr.msk.f32.mxu0 %vm266_vm2, %v1704_v19 }
  0x62   : > { %2516 = vmatmul.mubr.msk.f32.gmra.mrb[38].mxu0 %vm266_vm2, %v1707_v20 }
  0xe9   : > { %v2396_v26 = vpop.f32.mrb[0].mxu0 }
  0xea   : > { %v401_v28 = vadd.f32 %v2396_v26, %v257_v25  ;;  %v361_v29 = vpop.f32.mrb[1].mxu0 }
  0xeb   : > { %v400_v30 = vadd.f32 %v361_v29, %v256_v27  ;;  %v2410_v32 = vpop.f32.mrb[0].mxu1 }
  0xec   : > { %409 = vst.msk [vmem:[#allocation2 + $0x8] sm:$0xff] %vm199_vm1, %v401_v28  ;;  %v520_v34 = vpop.f32.mrb[1].mxu1 }
  0xed   : > { %408 = vst.msk [vmem:[#allocation2] sm:$0xff] %vm199_vm1, %v400_v30  ;;  %v2399_v35 = vpop.f32.mrb[2].mxu0 }
  0xee   : > { %v403_v36 = vadd.f32 %v2399_v35, %v259_v31  ;;  %v371_v37 = vpop.f32.mrb[3].mxu0 }
  0xef   : > { %v402_v38 = vadd.f32 %v371_v37, %v258_v33  ;;  %v2413_v40 = vpop.f32.mrb[2].mxu1 }
  0xf0   : > { %411 = vst.msk [vmem:[#allocation2 + $0x18] sm:$0xff] %vm199_vm1, %v403_v36  ;;  %v530_v42 = vpop.f32.mrb[3].mxu1 }
  0xf1   : > { %410 = vst.msk [vmem:[#allocation2 + $0x10] sm:$0xff] %vm199_vm1, %v402_v38  ;;  %v2402_v43 = vpop.f32.mrb[4].mxu0 }
  0xf2   : > { %v405_v44 = vadd.f32 %v2402_v43, %v261_v39  ;;  %v381_v45 = vpop.f32.mrb[5].mxu0 }
  0xf3   : > { %v404_v46 = vadd.f32 %v381_v45, %v260_v41  ;;  %v417_v47 = vld [vmem:[#allocation2 + $0x8] sm:$0xff]  ;;  %v2416_v49 = vpop.f32.mrb[4].mxu1 }
  0xf4   : > { %413 = vst.msk [vmem:[#allocation2 + $0x28] sm:$0xff] %vm199_vm1, %v405_v44  ;;  %v560_v50 = vadd.f32 %v2410_v32, %v417_v47  ;;  %v416_v52 = vld [vmem:[#allocation2] sm:$0xff]  ;;  %v540_v54 = vpop.f32.mrb[5].mxu1 }
  0xf5   : > { %412 = vst.msk [vmem:[#allocation2 + $0x20] sm:$0xff] %vm199_vm1, %v404_v46  ;;  %v559_v55 = vadd.f32 %v520_v34, %v416_v52  ;;  %v2405_v56 = vpop.f32.mrb[6].mxu0 }
  0xf6   : > { %568 = vst.msk [vmem:[#allocation2 + $0x8] sm:$0xff] %vm199_vm1, %v560_v50  ;;  %v407_v57 = vadd.f32 %v2405_v56, %v263_v48  ;;  %v391_v58 = vpop.f32.mrb[7].mxu0 }
  0xf7   : > { %567 = vst.msk [vmem:[#allocation2] sm:$0xff] %vm199_vm1, %v559_v55  ;;  %v406_v59 = vadd.f32 %v391_v58, %v262_v53  ;;  %v419_v60 = vld [vmem:[#allocation2 + $0x18] sm:$0xff]  ;;  %v2419_v62 = vpop.f32.mrb[6].mxu1 }
  0xf8   : > { %415 = vst.msk [vmem:[#allocation2 + $0x38] sm:$0xff] %vm199_vm1, %v407_v57  ;;  %v562_v63 = vadd.f32 %v2413_v40, %v419_v60  ;;  %v418_v0 = vld [vmem:[#allocation2 + $0x10] sm:$0xff]  ;;  %v550_v1 = vpop.f32.mrb[7].mxu1 }
  0xf9   : > { %414 = vst.msk [vmem:[#allocation2 + $0x30] sm:$0xff] %vm199_vm1, %v406_v59  ;;  %v561_v3 = vadd.f32 %v530_v42, %v418_v0  ;;  %v2424_v4 = vpop.f32.mrb[8].mxu0 }
  0xfa   : > { %570 = vst.msk [vmem:[#allocation2 + $0x18] sm:$0xff] %vm199_vm1, %v562_v63  ;;  %v704_v5 = vpop.f32.mrb[9].mxu0 }
  0xfb   : > { %569 = vst.msk [vmem:[#allocation2 + $0x10] sm:$0xff] %vm199_vm1, %v561_v3  ;;  %v421_v6 = vld [vmem:[#allocation2 + $0x28] sm:$0xff]  ;;  %v2438_v7 = vpop.f32.mrb[8].mxu1 }
  0xfc   : > { %v564_v51 = vadd.f32 %v2416_v49, %v421_v6  ;;  %v420_v8 = vld [vmem:[#allocation2 + $0x20] sm:$0xff]  ;;  %v912_v61 = vpop.f32.mrb[9].mxu1 }
  0xfd   : > { %v563_v10 = vadd.f32 %v540_v54, %v420_v8  ;;  %v609_v12 = vld [vmem:[#allocation2 + $0x8] sm:$0xff]  ;;  %v2427_v13 = vpop.f32.mrb[10].mxu0 }
  0xfe   : > { %572 = vst.msk [vmem:[#allocation2 + $0x28] sm:$0xff] %vm199_vm1, %v564_v51  ;;  %v744_v14 = vadd.f32 %v2424_v4, %v609_v12  ;;  %v608_v15 = vld [vmem:[#allocation2] sm:$0xff]  ;;  %v714_v2 = vpop.f32.mrb[11].mxu0 }
  0xff   : > { %571 = vst.msk [vmem:[#allocation2 + $0x20] sm:$0xff] %vm199_vm1, %v563_v10  ;;  %v743_v11 = vadd.f32 %v704_v5, %v608_v15  ;;  %v423_v16 = vld [vmem:[#allocation2 + $0x38] sm:$0xff]  ;;  %v2441_v18 = vpop.f32.mrb[10].mxu1 }
 0x100   : > { %752 = vst.msk [vmem:[#allocation2 + $0x8] sm:$0xff] %vm199_vm1, %v744_v14  ;;  %v566_v19 = vadd.f32 %v2419_v62, %v423_v16  ;;  %v422_v20 = vld [vmem:[#allocation2 + $0x30] sm:$0xff]  ;;  %v922_v22 = vpop.f32.mrb[11].mxu1 }
 0x101   : > { %751 = vst.msk [vmem:[#allocation2] sm:$0xff] %vm199_vm1, %v743_v11  ;;  %v565_v9 = vadd.f32 %v550_v1, %v422_v20  ;;  %v611_v21 = vld [vmem:[#allocation2 + $0x18] sm:$0xff]  ;;  %v2430_v23 = vpop.f32.mrb[12].mxu0 }
 0x102   : > { %574 = vst.msk [vmem:[#allocation2 + $0x38] sm:$0xff] %vm199_vm1, %v566_v19  ;;  %v746_v24 = vadd.f32 %v2427_v13, %v611_v21  ;;  %v610_v17 = vld [vmem:[#allocation2 + $0x10] sm:$0xff]  ;;  %v724_v25 = vpop.f32.mrb[13].mxu0 }
 0x103   : > { %573 = vst.msk [vmem:[#allocation2 + $0x30] sm:$0xff] %vm199_vm1, %v565_v9  ;;  %v745_v27 = vadd.f32 %v714_v2, %v610_v17  ;;  %v2444_v26 = vpop.f32.mrb[12].mxu1 }
 0x104   : > { %754 = vst.msk [vmem:[#allocation2 + $0x18] sm:$0xff] %vm199_vm1, %v746_v24  ;;  %v932_v28 = vpop.f32.mrb[13].mxu1 }
 0x105   : > { %753 = vst.msk [vmem:[#allocation2 + $0x10] sm:$0xff] %vm199_vm1, %v745_v27  ;;  %v613_v29 = vld [vmem:[#allocation2 + $0x28] sm:$0xff]  ;;  %v2433_v30 = vpop.f32.mrb[14].mxu0 }
 0x106   : > { %v748_v31 = vadd.f32 %v2430_v23, %v613_v29  ;;  %v612_v32 = vld [vmem:[#allocation2 + $0x20] sm:$0xff]  ;;  %v734_v33 = vpop.f32.mrb[15].mxu0 }
 0x107   : > { %v747_v34 = vadd.f32 %v724_v25, %v612_v32  ;;  %v809_v35 = vld [vmem:[#allocation2 + $0x8] sm:$0xff]  ;;  %v2447_v36 = vpop.f32.mrb[14].mxu1 }
 0x108   : > { %756 = vst.msk [vmem:[#allocation2 + $0x28] sm:$0xff] %vm199_vm1, %v748_v31  ;;  %v952_v37 = vadd.f32 %v2438_v7, %v809_v35  ;;  %v808_v38 = vld [vmem:[#allocation2] sm:$0xff]  ;;  %v942_v39 = vpop.f32.mrb[15].mxu1 }
 0x109   : > { %755 = vst.msk [vmem:[#allocation2 + $0x20] sm:$0xff] %vm199_vm1, %v747_v34  ;;  %v951_v40 = vadd.f32 %v912_v61, %v808_v38  ;;  %v615_v41 = vld [vmem:[#allocation2 + $0x38] sm:$0xff]  ;;  %v2452_v42 = vpop.f32.mrb[16].mxu0 }
 0x10a   : > { %960 = vst.msk [vmem:[#allocation2 + $0x8] sm:$0xff] %vm199_vm1, %v952_v37  ;;  %v750_v43 = vadd.f32 %v2433_v30, %v615_v41  ;;  %v614_v44 = vld [vmem:[#allocation2 + $0x30] sm:$0xff]  ;;  %v1071_v45 = vpop.f32.mrb[17].mxu0 }
 0x10b   : > { %959 = vst.msk [vmem:[#allocation2] sm:$0xff] %vm199_vm1, %v951_v40  ;;  %v749_v46 = vadd.f32 %v734_v33, %v614_v44  ;;  %v811_v47 = vld [vmem:[#allocation2 + $0x18] sm:$0xff]  ;;  %v2466_v48 = vpop.f32.mrb[16].mxu1 }
 0x10c   : > { %758 = vst.msk [vmem:[#allocation2 + $0x38] sm:$0xff] %vm199_vm1, %v750_v43  ;;  %v954_v49 = vadd.f32 %v2441_v18, %v811_v47  ;;  %v810_v50 = vld [vmem:[#allocation2 + $0x10] sm:$0xff]  ;;  %v1254_v52 = vpop.f32.mrb[17].mxu1 }
 0x10d   : > { %757 = vst.msk [vmem:[#allocation2 + $0x30] sm:$0xff] %vm199_vm1, %v749_v46  ;;  %v953_v53 = vadd.f32 %v922_v22, %v810_v50  ;;  %v2455_v54 = vpop.f32.mrb[18].mxu0 }
 0x10e   : > { %962 = vst.msk [vmem:[#allocation2 + $0x18] sm:$0xff] %vm199_vm1, %v954_v49  ;;  %v1081_v55 = vpop.f32.mrb[19].mxu0 }
 0x10f   : > { %961 = vst.msk [vmem:[#allocation2 + $0x10] sm:$0xff] %vm199_vm1, %v953_v53  ;;  %v813_v56 = vld [vmem:[#allocation2 + $0x28] sm:$0xff]  ;;  %v2469_v57 = vpop.f32.mrb[18].mxu1 }
 0x110   : > { %v956_v58 = vadd.f32 %v2444_v26, %v813_v56  ;;  %v812_v59 = vld [vmem:[#allocation2 + $0x20] sm:$0xff]  ;;  %v1264_v60 = vpop.f32.mrb[19].mxu1 }
 0x111   : > { %v955_v62 = vadd.f32 %v932_v28, %v812_v59  ;;  %v968_v63 = vld [vmem:[#allocation2 + $0x8] sm:$0xff]  ;;  %v2458_v0 = vpop.f32.mrb[20].mxu0 }
 0x112   : > { %964 = vst.msk [vmem:[#allocation2 + $0x28] sm:$0xff] %vm199_vm1, %v956_v58  ;;  %v1111_v1 = vadd.f32 %v2452_v42, %v968_v63  ;;  %v967_v3 = vld [vmem:[#allocation2] sm:$0xff]  ;;  %v1091_v4 = vpop.f32.mrb[21].mxu0 }
 0x113   : > { %963 = vst.msk [vmem:[#allocation2 + $0x20] sm:$0xff] %vm199_vm1, %v955_v62  ;;  %v1110_v5 = vadd.f32 %v1071_v45, %v967_v3  ;;  %v815_v6 = vld [vmem:[#allocation2 + $0x38] sm:$0xff]  ;;  %v2472_v7 = vpop.f32.mrb[20].mxu1 }
 0x114   : > { %1119 = vst.msk [vmem:[#allocation2 + $0x8] sm:$0xff] %vm199_vm1, %v1111_v1  ;;  %v958_v51 = vadd.f32 %v2447_v36, %v815_v6  ;;  %v814_v8 = vld [vmem:[#allocation2 + $0x30] sm:$0xff]  ;;  %v1274_v61 = vpop.f32.mrb[21].mxu1 }
 0x115   : > { %1118 = vst.msk [vmem:[#allocation2] sm:$0xff] %vm199_vm1, %v1110_v5  ;;  %v957_v10 = vadd.f32 %v942_v39, %v814_v8  ;;  %v970_v12 = vld [vmem:[#allocation2 + $0x18] sm:$0xff]  ;;  %v2461_v13 = vpop.f32.mrb[22].mxu0 }
 0x116   : > { %966 = vst.msk [vmem:[#allocation2 + $0x38] sm:$0xff] %vm199_vm1, %v958_v51  ;;  %v1113_v14 = vadd.f32 %v2455_v54, %v970_v12  ;;  %v969_v15 = vld [vmem:[#allocation2 + $0x10] sm:$0xff]  ;;  %v1101_v2 = vpop.f32.mrb[23].mxu0 }
 0x117   : > { %965 = vst.msk [vmem:[#allocation2 + $0x30] sm:$0xff] %vm199_vm1, %v957_v10  ;;  %v1112_v11 = vadd.f32 %v1081_v55, %v969_v15  ;;  %v2475_v16 = vpop.f32.mrb[22].mxu1 }
 0x118   : > { %1121 = vst.msk [vmem:[#allocation2 + $0x18] sm:$0xff] %vm199_vm1, %v1113_v14  ;;  %v1284_v18 = vpop.f32.mrb[23].mxu1 }
 0x119   : > { %1120 = vst.msk [vmem:[#allocation2 + $0x10] sm:$0xff] %vm199_vm1, %v1112_v11  ;;  %v972_v19 = vld [vmem:[#allocation2 + $0x28] sm:$0xff]  ;;  %v2480_v20 = vpop.f32.mrb[24].mxu0 }
 0x11a   : > { %v1115_v22 = vadd.f32 %v2458_v0, %v972_v19  ;;  %v971_v9 = vld [vmem:[#allocation2 + $0x20] sm:$0xff]  ;;  %v1462_v21 = vpop.f32.mrb[25].mxu0 }
 0x11b   : > { %v1114_v23 = vadd.f32 %v1091_v4, %v971_v9  ;;  %v1159_v24 = vld [vmem:[#allocation2 + $0x8] sm:$0xff]  ;;  %v2955_v17 = vpop.f32.mrb[24].mxu1 }
 0x11c   : > { %1123 = vst.msk [vmem:[#allocation2 + $0x28] sm:$0xff] %vm199_vm1, %v1115_v22  ;;  %v1294_v25 = vadd.f32 %v2466_v48, %v1159_v24  ;;  %v1158_v27 = vld [vmem:[#allocation2] sm:$0xff]  ;;  %v2958_v26 = vpop.f32.mrb[25].mxu1 }
 0x11d   : > { %1122 = vst.msk [vmem:[#allocation2 + $0x20] sm:$0xff] %vm199_vm1, %v1114_v23  ;;  %v1293_v28 = vadd.f32 %v1254_v52, %v1158_v27  ;;  %v974_v29 = vld [vmem:[#allocation2 + $0x38] sm:$0xff]  ;;  %v2483_v30 = vpop.f32.mrb[26].mxu0 }
 0x11e   : > { %1302 = vst.msk [vmem:[#allocation2 + $0x8] sm:$0xff] %vm199_vm1, %v1294_v25  ;;  %v1117_v31 = vadd.f32 %v2461_v13, %v974_v29  ;;  %v973_v32 = vld [vmem:[#allocation2 + $0x30] sm:$0xff]  ;;  %v1472_v33 = vpop.f32.mrb[27].mxu0 }
 0x11f   : > { %1301 = vst.msk [vmem:[#allocation2] sm:$0xff] %vm199_vm1, %v1293_v28  ;;  %v1116_v34 = vadd.f32 %v1101_v2, %v973_v32  ;;  %v1161_v35 = vld [vmem:[#allocation2 + $0x18] sm:$0xff]  ;;  %v2963_v36 = vpop.f32.mrb[26].mxu1 }
 0x120   : > { %1125 = vst.msk [vmem:[#allocation2 + $0x38] sm:$0xff] %vm199_vm1, %v1117_v31  ;;  %v1296_v37 = vadd.f32 %v2469_v57, %v1161_v35  ;;  %v1160_v38 = vld [vmem:[#allocation2 + $0x10] sm:$0xff]  ;;  %v2966_v39 = vpop.f32.mrb[27].mxu1 }
 0x121   : > { %1124 = vst.msk [vmem:[#allocation2 + $0x30] sm:$0xff] %vm199_vm1, %v1116_v34  ;;  %v1295_v40 = vadd.f32 %v1264_v60, %v1160_v38  ;;  %v2486_v41 = vpop.f32.mrb[28].mxu0 }
 0x122   : > { %1304 = vst.msk [vmem:[#allocation2 + $0x18] sm:$0xff] %vm199_vm1, %v1296_v37  ;;  %v1482_v42 = vpop.f32.mrb[29].mxu0 }
 0x123   : > { %1303 = vst.msk [vmem:[#allocation2 + $0x10] sm:$0xff] %vm199_vm1, %v1295_v40  ;;  %v1163_v43 = vld [vmem:[#allocation2 + $0x28] sm:$0xff]  ;;  %v2500_v44 = vpop.f32.mrb[28].mxu1 }
 0x124   : > { %v1298_v45 = vadd.f32 %v2472_v7, %v1163_v43  ;;  %v1162_v46 = vld [vmem:[#allocation2 + $0x20] sm:$0xff]  ;;  %v1641_v47 = vpop.f32.mrb[29].mxu1 }
 0x125   : > { %v1297_v48 = vadd.f32 %v1274_v61, %v1162_v46  ;;  %v1359_v49 = vld [vmem:[#allocation2 + $0x8] sm:$0xff]  ;;  %v2489_v50 = vpop.f32.mrb[30].mxu0 }
 0x126   : > { %1306 = vst.msk [vmem:[#allocation2 + $0x28] sm:$0xff] %vm199_vm1, %v1298_v45  ;;  %v1502_v52 = vadd.f32 %v2480_v20, %v1359_v49  ;;  %v1358_v53 = vld [vmem:[#allocation2] sm:$0xff]  ;;  %v1492_v54 = vpop.f32.mrb[31].mxu0 }
 0x127   : > { %1305 = vst.msk [vmem:[#allocation2 + $0x20] sm:$0xff] %vm199_vm1, %v1297_v48  ;;  %v1501_v55 = vadd.f32 %v1462_v21, %v1358_v53  ;;  %v1165_v56 = vld [vmem:[#allocation2 + $0x38] sm:$0xff]  ;;  %v2503_v57 = vpop.f32.mrb[30].mxu1 }
 0x128   : > { %1510 = vst.msk [vmem:[#allocation2 + $0x8] sm:$0xff] %vm199_vm1, %v1502_v52  ;;  %v1300_v58 = vadd.f32 %v2475_v16, %v1165_v56  ;;  %v1164_v59 = vld [vmem:[#allocation2 + $0x30] sm:$0xff]  ;;  %v1651_v60 = vpop.f32.mrb[31].mxu1 }
 0x129   : > { %1509 = vst.msk [vmem:[#allocation2] sm:$0xff] %vm199_vm1, %v1501_v55  ;;  %v1299_v62 = vadd.f32 %v1284_v18, %v1164_v59  ;;  %v1361_v63 = vld [vmem:[#allocation2 + $0x18] sm:$0xff]  ;;  %v2508_v0 = vpop.f32.mrb[32].mxu0 }
 0x12a   : > { %1308 = vst.msk [vmem:[#allocation2 + $0x38] sm:$0xff] %vm199_vm1, %v1300_v58  ;;  %v1504_v1 = vadd.f32 %v2483_v30, %v1361_v63  ;;  %v1360_v3 = vld [vmem:[#allocation2 + $0x10] sm:$0xff]  ;;  %v1804_v4 = vpop.f32.mrb[33].mxu0 }
 0x12b   : > { %1307 = vst.msk [vmem:[#allocation2 + $0x30] sm:$0xff] %vm199_vm1, %v1299_v62  ;;  %v1503_v5 = vadd.f32 %v1472_v33, %v1360_v3 }
 0x12c   : > { %1512 = vst.msk [vmem:[#allocation2 + $0x18] sm:$0xff] %vm199_vm1, %v1504_v1 }
 0x12d   : > { %1511 = vst.msk [vmem:[#allocation2 + $0x10] sm:$0xff] %vm199_vm1, %v1503_v5  ;;  %v1363_v6 = vld [vmem:[#allocation2 + $0x28] sm:$0xff]  ;;  %v2511_v7 = vpop.f32.mrb[34].mxu0 }
 0x12e   : > { %v1506_v51 = vadd.f32 %v2486_v41, %v1363_v6  ;;  %v1362_v8 = vld [vmem:[#allocation2 + $0x20] sm:$0xff]  ;;  %v1814_v61 = vpop.f32.mrb[35].mxu0 }
 0x12f   : > { %v1505_v10 = vadd.f32 %v1482_v42, %v1362_v8  ;;  %v1518_v12 = vld [vmem:[#allocation2 + $0x8] sm:$0xff]  ;;  %v2288_v42 = vld [vmem:[%s3081_s2] ss:$0 sm:$0xff] }
 0x130   : > { %1514 = vst.msk [vmem:[#allocation2 + $0x28] sm:$0xff] %vm199_vm1, %v1506_v51  ;;  %v1661_v13 = vadd.f32 %v2955_v17, %v1518_v12  ;;  %v1517_v14 = vld [vmem:[#allocation2] sm:$0xff] }
 0x131   : > { %1513 = vst.msk [vmem:[#allocation2 + $0x20] sm:$0xff] %vm199_vm1, %v1505_v10  ;;  %v1660_v15 = vadd.f32 %v2958_v26, %v1517_v14  ;;  %v1365_v2 = vld [vmem:[#allocation2 + $0x38] sm:$0xff]  ;;  %v2514_v11 = vpop.f32.mrb[36].mxu0 }
 0x132   : > { %1669 = vst.msk [vmem:[#allocation2 + $0x8] sm:$0xff] %vm199_vm1, %v1661_v13  ;;  %v1508_v16 = vadd.f32 %v2489_v50, %v1365_v2  ;;  %v1364_v18 = vld [vmem:[#allocation2 + $0x30] sm:$0xff]  ;;  %v1824_v19 = vpop.f32.mrb[37].mxu0 }
 0x133   : > { %1668 = vst.msk [vmem:[#allocation2] sm:$0xff] %vm199_vm1, %v1660_v15  ;;  %v1507_v20 = vadd.f32 %v1492_v54, %v1364_v18  ;;  %v1520_v22 = vld [vmem:[#allocation2 + $0x18] sm:$0xff] }
 0x134   : > { %1516 = vst.msk [vmem:[#allocation2 + $0x38] sm:$0xff] %vm199_vm1, %v1508_v16  ;;  %v1663_v9 = vadd.f32 %v2963_v36, %v1520_v22  ;;  %v1519_v21 = vld [vmem:[#allocation2 + $0x10] sm:$0xff] }
 0x135   : > { %1515 = vst.msk [vmem:[#allocation2 + $0x30] sm:$0xff] %vm199_vm1, %v1507_v20  ;;  %v1662_v23 = vadd.f32 %v2966_v39, %v1519_v21  ;;  %v2517_v24 = vpop.f32.mrb[38].mxu0 }
 0x136   : > { %1671 = vst.msk [vmem:[#allocation2 + $0x18] sm:$0xff] %vm199_vm1, %v1663_v9  ;;  %v1834_v17 = vpop.f32.mrb[39].mxu0 }
 0x137   : > { %1670 = vst.msk [vmem:[#allocation2 + $0x10] sm:$0xff] %vm199_vm1, %v1662_v23  ;;  %v1522_v25 = vld [vmem:[#allocation2 + $0x28] sm:$0xff] }
 0x138   : > { %v1665_v27 = vadd.f32 %v2500_v44, %v1522_v25  ;;  %v1521_v26 = vld [vmem:[#allocation2 + $0x20] sm:$0xff] }
 0x139   : > { %v1664_v28 = vadd.f32 %v1641_v47, %v1521_v26  ;;  %v1709_v29 = vld [vmem:[#allocation2 + $0x8] sm:$0xff] }
 0x13a   : > { %1673 = vst.msk [vmem:[#allocation2 + $0x28] sm:$0xff] %vm199_vm1, %v1665_v27  ;;  %v1844_v30 = vadd.f32 %v2508_v0, %v1709_v29  ;;  %v1708_v31 = vld [vmem:[#allocation2] sm:$0xff] }
 0x13b   : > { %1672 = vst.msk [vmem:[#allocation2 + $0x20] sm:$0xff] %vm199_vm1, %v1664_v28  ;;  %v1843_v32 = vadd.f32 %v1804_v4, %v1708_v31  ;;  %v1524_v33 = vld [vmem:[#allocation2 + $0x38] sm:$0xff] }
 0x13c   : > { %1852 = vst.msk [vmem:[#allocation2 + $0x8] sm:$0xff] %vm199_vm1, %v1844_v30  ;;  %v1667_v34 = vadd.f32 %v2503_v57, %v1524_v33  ;;  %v1523_v35 = vld [vmem:[#allocation2 + $0x30] sm:$0xff] }
 0x13d   : > { %1851 = vst.msk [vmem:[#allocation2] sm:$0xff] %vm199_vm1, %v1843_v32  ;;  %v1666_v36 = vadd.f32 %v1651_v60, %v1523_v35  ;;  %v1711_v37 = vld [vmem:[#allocation2 + $0x18] sm:$0xff] }
 0x13e   : > { %1675 = vst.msk [vmem:[#allocation2 + $0x38] sm:$0xff] %vm199_vm1, %v1667_v34  ;;  %v1846_v38 = vadd.f32 %v2511_v7, %v1711_v37  ;;  %v1710_v39 = vld [vmem:[#allocation2 + $0x10] sm:$0xff] }
 0x13f   : > { %1674 = vst.msk [vmem:[#allocation2 + $0x30] sm:$0xff] %vm199_vm1, %v1666_v36  ;;  %v1845_v40 = vadd.f32 %v1814_v61, %v1710_v39 }
 0x140   : > { %1854 = vst.msk [vmem:[#allocation2 + $0x18] sm:$0xff] %vm199_vm1, %v1846_v38 }
 0x141   : > { %1853 = vst.msk [vmem:[#allocation2 + $0x10] sm:$0xff] %vm199_vm1, %v1845_v40  ;;  %v1713_v41 = vld [vmem:[#allocation2 + $0x28] sm:$0xff] }
 0x142   : > { %v1848_v43 = vadd.f32 %v2514_v11, %v1713_v41  ;;  %v1712_v44 = vld [vmem:[#allocation2 + $0x20] sm:$0xff] }
 0x143   : > { %v1847_v45 = vadd.f32 %v1824_v19, %v1712_v44  ;;  %v1860_v46 = vld [vmem:[#allocation2 + $0x8] sm:$0xff] }
 0x144   : > { %1856 = vst.msk [vmem:[#allocation2 + $0x28] sm:$0xff] %vm199_vm1, %v1848_v43  ;;  %v1859_v47 = vld [vmem:[#allocation2] sm:$0xff]  ;;  %v3003_v48 = vadd.f32 %v2288_v42, %v1860_v46 }
 0x145   : > { %1855 = vst.msk [vmem:[#allocation2 + $0x20] sm:$0xff] %vm199_vm1, %v1847_v45  ;;  %v1715_v49 = vld [vmem:[#allocation2 + $0x38] sm:$0xff]  ;;  %v3006_v50 = vadd.f32 %v2288_v42, %v1859_v47 }
 0x146   : > { %v1850_v52 = vadd.f32 %v2517_v24, %v1715_v49  ;;  %v1714_v53 = vld [vmem:[#allocation2 + $0x30] sm:$0xff]  ;;  %v1883_v57 = vmul.f32 %v3003_v48, %v3003_v48 }
 0x147   : > { %v1849_v54 = vadd.f32 %v1834_v17, %v1714_v53  ;;  %v1882_v55 = vmul.f32 %v3006_v50, %v3006_v50  ;;  %v1862_v56 = vld [vmem:[#allocation2 + $0x18] sm:$0xff] }
 0x148   : > { %1858 = vst.msk [vmem:[#allocation2 + $0x38] sm:$0xff] %vm199_vm1, %v1850_v52  ;;  %v1861_v58 = vld [vmem:[#allocation2 + $0x10] sm:$0xff]  ;;  %v3013_v59 = vadd.f32 %v2288_v42, %v1862_v56 }
 0x149   : > { %1857 = vst.msk [vmem:[#allocation2 + $0x30] sm:$0xff] %vm199_vm1, %v1849_v54  ;;  %2526 = vmatprep.mubr.msk.f32.mxu1 %vm199_vm1, %v1882_v55  ;;  %v3017_v60 = vadd.f32 %v2288_v42, %v1861_v58 }
 0x14a   : > { %2527 = vmatmul.mubr.msk.f32.vlgmr.msra.gmra.mrb[32].mxu1 %vm199_vm1, %v1883_v57  ;;  %v1885_v0 = vmul.f32 %v3013_v59, %v3013_v59 }
 0x14b   : > { %v1884_v62 = vmul.f32 %v3017_v60, %v3017_v60  ;;  %v1864_v63 = vld [vmem:[#allocation2 + $0x28] sm:$0xff] }
 0x14c   : > { %v1863_v1 = vld [vmem:[#allocation2 + $0x20] sm:$0xff]  ;;  %v3024_v3 = vadd.f32 %v2288_v42, %v1864_v63 }
 0x14d   : > { %2529 = vmatprep.mubr.msk.f32.mxu1 %vm199_vm1, %v1884_v62  ;;  %v3027_v4 = vadd.f32 %v2288_v42, %v1863_v1 }
 0x14e   : > { %2530 = vmatmul.mubr.msk.f32.gmra.mrb[34].mxu1 %vm199_vm1, %v1885_v0  ;;  %v1887_v7 = vmul.f32 %v3024_v3, %v3024_v3 }
 0x14f   : > { %v1886_v5 = vmul.f32 %v3027_v4, %v3027_v4  ;;  %v1866_v6 = vld [vmem:[#allocation2 + $0x38] sm:$0xff] }
 0x150   : > { %v1865_v51 = vld [vmem:[#allocation2 + $0x30] sm:$0xff]  ;;  %v3034_v8 = vadd.f32 %v2288_v42, %v1866_v6 }
 0x151   : > { %2532 = vmatprep.mubr.msk.f32.mxu1 %vm199_vm1, %v1886_v5  ;;  %v3037_v61 = vadd.f32 %v2288_v42, %v1865_v51 }
 0x152   : > { %2533 = vmatmul.mubr.msk.f32.gmra.mrb[36].mxu1 %vm199_vm1, %v1887_v7  ;;  %v1889_v12 = vmul.f32 %v3034_v8, %v3034_v8 }
 0x153   : > { %v1888_v10 = vmul.f32 %v3037_v61, %v3037_v61 }
 0x155   : > { %2535 = vmatprep.mubr.msk.f32.mxu1 %vm199_vm1, %v1888_v10 }
 0x156   : > { %2536 = vmatmul.mubr.msk.f32.gmra.mrb[38].mxu1 %vm199_vm1, %v1889_v12 }
 0x21d   : > { %v2528_v13 = vpop.f32.mrb[32].mxu1 }
 0x21e   : > { %v2024_v14 = vadd.f32 1e-12, %v2528_v13  ;;  %v2048_v15 = vadd.f32 1.0, %v2528_v13  ;;  %v1984_v2 = vpop.f32.mrb[33].mxu1 }
 0x21f   : > { %v2023_v11 = vadd.f32 1e-12, %v1984_v2  ;;  %v2047_v16 = vadd.f32 1.0, %v1984_v2 }
 0x220   : > { %2556 = vrsqrt.f32 %v2024_v14 }
 0x221   : > { %2558 = vrcp.f32 %v2048_v15  ;;  %v2531_v18 = vpop.f32.mrb[34].mxu1 }
 0x222   : > { %2560 = vrsqrt.f32 %v2023_v11  ;;  %v2026_v19 = vadd.f32 1e-12, %v2531_v18  ;;  %v2050_v20 = vadd.f32 1.0, %v2531_v18  ;;  %v1994_v22 = vpop.f32.mrb[35].mxu1 }
 0x223   : > { %2562 = vrcp.f32 %v2047_v16  ;;  %v2025_v9 = vadd.f32 1e-12, %v1994_v22  ;;  %v2049_v21 = vadd.f32 1.0, %v1994_v22 }
 0x224   : > { %2564 = vrsqrt.f32 %v2026_v19 }
 0x225   : > { %2566 = vrcp.f32 %v2050_v20  ;;  %v2534_v23 = vpop.f32.mrb[36].mxu1 }
 0x226   : > { %2568 = vrsqrt.f32 %v2025_v9  ;;  %v2028_v24 = vadd.f32 1e-12, %v2534_v23  ;;  %v2052_v17 = vadd.f32 1.0, %v2534_v23  ;;  %v2004_v25 = vpop.f32.mrb[37].mxu1 }
 0x227   : > { %2570 = vrcp.f32 %v2049_v21  ;;  %v2027_v27 = vadd.f32 1e-12, %v2004_v25  ;;  %v2051_v26 = vadd.f32 1.0, %v2004_v25 }
 0x228   : > { %2572 = vrsqrt.f32 %v2028_v24 }
 0x229   : > { %2574 = vrcp.f32 %v2052_v17  ;;  %v2537_v28 = vpop.f32.mrb[38].mxu1 }
 0x22a   : > { %v2557_v29 = vpop.eup %2556  ;;  %2576 = vrsqrt.f32 %v2027_v27  ;;  %v2030_v30 = vadd.f32 1e-12, %v2537_v28  ;;  %v2054_v31 = vadd.f32 1.0, %v2537_v28  ;;  %v2014_v32 = vpop.f32.mrb[39].mxu1 }
 0x22b   : > { %v2559_v33 = vpop.eup %2558  ;;  %v2040_v34 = vmul.f32 %v2557_v29, %v2528_v13  ;;  %2578 = vrcp.f32 %v2051_v26  ;;  %v2029_v35 = vadd.f32 1e-12, %v2014_v32  ;;  %v2053_v37 = vadd.f32 1.0, %v2014_v32 }
 0x22c   : > { %v2561_v36 = vpop.eup %2560  ;;  %2580 = vrsqrt.f32 %v2030_v30 }
 0x22d   : > { %v2563_v38 = vpop.eup %2562  ;;  %v2064_v39 = vmul.f32 %v2559_v33, %v2040_v34  ;;  %v2039_v40 = vmul.f32 %v2561_v36, %v1984_v2  ;;  %2582 = vrcp.f32 %v2054_v31 }
 0x22e   : > { %v2565_v41 = vpop.eup %2564  ;;  %2584 = vrsqrt.f32 %v2029_v35 }
 0x22f   : > { %v2567_v42 = vpop.eup %2566  ;;  %v2072_v43 = vmul.f32 %v2064_v39, %v3003_v48  ;;  %v2063_v44 = vmul.f32 %v2563_v38, %v2039_v40  ;;  %v2042_v45 = vmul.f32 %v2565_v41, %v2531_v18  ;;  %2586 = vrcp.f32 %v2053_v37 }
 0x230   : > { %v2569_v46 = vpop.eup %2568 }
 0x231   : > { %v2571_v47 = vpop.eup %2570  ;;  %2080 = vst.msk [vmem:[%s3050_s29 + $0x8] sm:$0xff] %vm199_vm1, %v2072_v43  ;;  %v2071_v49 = vmul.f32 %v2063_v44, %v3006_v50  ;;  %v2066_v52 = vmul.f32 %v2567_v42, %v2042_v45  ;;  %v2041_v53 = vmul.f32 %v2569_v46, %v1994_v22 }
 0x232   : > { %v2573_v54 = vpop.eup %2572 }
 0x233   : > { %v2575_v55 = vpop.eup %2574  ;;  %2079 = vst.msk [vmem:[%s3050_s29] sm:$0xff] %vm199_vm1, %v2071_v49  ;;  %v2074_v56 = vmul.f32 %v2066_v52, %v3013_v59  ;;  %v2065_v48 = vmul.f32 %v2571_v47, %v2041_v53  ;;  %v2044_v57 = vmul.f32 %v2573_v54, %v2534_v23 }
 0x234   : > { %v2577_v58 = vpop.eup %2576 }
 0x235   : > { %v2579_v62 = vpop.eup %2578  ;;  %2082 = vst.msk [vmem:[%s3050_s29 + $0x18] sm:$0xff] %vm199_vm1, %v2074_v56  ;;  %v2073_v63 = vmul.f32 %v2065_v48, %v3017_v60  ;;  %v2068_v50 = vmul.f32 %v2575_v55, %v2044_v57  ;;  %v2043_v0 = vmul.f32 %v2577_v58, %v2004_v25 }
 0x236   : > { %v2581_v1 = vpop.eup %2580 }
 0x237   : > { %v2583_v5 = vpop.eup %2582  ;;  %2081 = vst.msk [vmem:[%s3050_s29 + $0x10] sm:$0xff] %vm199_vm1, %v2073_v63  ;;  %v2076_v59 = vmul.f32 %v2068_v50, %v3024_v3  ;;  %v2067_v6 = vmul.f32 %v2579_v62, %v2043_v0  ;;  %v2046_v7 = vmul.f32 %v2581_v1, %v2537_v28 }
 0x238   : > { %v2585_v51 = vpop.eup %2584 }
 0x239   : > { %2084 = vst.msk [vmem:[%s3050_s29 + $0x28] sm:$0xff] %vm199_vm1, %v2076_v59  ;;  %v2075_v10 = vmul.f32 %v2067_v6, %v3027_v4  ;;  %v2070_v12 = vmul.f32 %v2583_v5, %v2046_v7  ;;  %v2045_v13 = vmul.f32 %v2585_v51, %v2014_v32  ;;  %v2587_v60 = vpop.eup %2586 }
 0x23b   : > { %2083 = vst.msk [vmem:[%s3050_s29 + $0x20] sm:$0xff] %vm199_vm1, %v2075_v10  ;;  %v2078_v14 = vmul.f32 %v2070_v12, %v3034_v8  ;;  %v2069_v15 = vmul.f32 %v2587_v60, %v2045_v13 }
 0x23d   : > { %2086 = vst.msk [vmem:[%s3050_s29 + $0x38] sm:$0xff] %vm199_vm1, %v2078_v14  ;;  %v2077_v2 = vmul.f32 %v2069_v15, %v3037_v61 }
 0x23f   : > { %2085 = vst.msk [vmem:[%s3050_s29 + $0x30] sm:$0xff] %vm199_vm1, %v2077_v2 }
 0x240 PF: > { %s14_s15 = sadd.s32 1, %s2594_s15  }
 0x241   : > { %p11_p5 = scmp.ge.s32.totalorder %s14_s15, 4  }
 0x243   :  { %13 = sbr.rel (!%p11_p5) target bundleno = 1 (0x1), region = 76 }

</bundles_post_ra>
